<compile_context>
chip_gen: v5e
topology: v5e:2x2
jax: 0.10.0
libtpu: 0.0.40
codegen_flags: <defaults>
</compile_context>

<pallas_src>
import functools

import jax
import jax.numpy as jnp
import numpy as np
from jax.experimental import pallas as pl
from jax.experimental.pallas import tpu as pltpu


_WORKING_SET_BUDGET = 16 * 1024 * 1024  # per-step f32 intermediates budget


def _working_set_bytes(block_b, n, dim, num_heads, itemsize):
    """Rough upper bound on in-kernel (vreg / VMEM-spill) intermediates."""
    m = block_b * n
    g = block_b * num_heads
    return (m * 3 * dim * (4 + itemsize)      # fused qkv (f32) + model-dtype copy
            + 3 * m * dim * itemsize          # q/k/v head stacks
            + 2 * g * n * n * 4               # dots + p (worst case f32)
            + m * dim * (8 + 2 * itemsize))   # out_h/proj accum (f32) + casts


def _pick_block_b(b, n, dim, num_heads, itemsize):
    """Batch rows per grid step.

    Smallest divisor of b whose M = block_b*n fills the MXU's 256-row tile
    (v6e/v7x; >=128 also covers v5e), capped so the f32 score / intermediate
    working set stays well under VMEM.  Falls back to 1 when n is not
    sublane-aligned (keeps the in-kernel per-batch row slices cheap).
    """
    if n % 8 != 0:
        return 1
    best = 1
    for cand in range(1, b + 1):
        if b % cand:
            continue
        if _working_set_bytes(cand, n, dim, num_heads, itemsize) > _WORKING_SET_BUDGET:
            break
        best = cand
        if cand * n >= 256:
            break
    return best


def _vmem_limit_bytes(block_b, n, dim, num_heads, itemsize):
    """Shape-aware VMEM request (replaces the fixed 48 MiB of the last rev).

    Leaves headroom on v7x (64 MiB/TC) while allowing larger per-step blocks
    on v5e/v6e (128 MiB physical).
    """
    io_block = block_b * n * dim * itemsize
    weights = 4 * dim * dim * itemsize + 8 * dim * 4       # W_qkv^T + W_proj^T + bias
    need = (2 * 2 * io_block                                # x + out blocks, double-buffered
            + 2 * weights                                   # weight blocks (constant index_map)
            + _working_set_bytes(block_b, n, dim, num_heads, itemsize)
            + (8 << 20))                                    # compiler-scratch headroom
    try:
        cap = int(0.85 * pltpu.get_tpu_info().vmem_capacity_bytes)
    except Exception:  # pragma: no cover - conservative fallback
        cap = 54 << 20                                      # v7x-safe (64 MiB physical)
    return int(min(max(need, 32 << 20), max(cap, 32 << 20)))


def attention_kernel(x_ref, wqkv_ref, wproj_ref, bproj_ref, o_ref, *,
                     num_heads, seq_len, exp_dtype):
    """One grid step == `block_b` batch rows, flattened to (M, D) = (bt*N, D)."""
    m_rows, dim = x_ref.shape
    n = seq_len
    bt = m_rows // n
    d = dim // num_heads
    in_dt = x_ref.dtype

    # --- fused qkv projection: one wide MXU matmul (K = D), f32 accumulation.
    # The softmax scale is pre-folded into the q columns of W_qkv (wrapper).
    qkv = jnp.dot(x_ref[...], wqkv_ref[...],
                  preferred_element_type=jnp.float32)           # (M, 3D) f32
    qkv = qkv.astype(in_dt)                                      # single cast

    # Head split 'm (qkv h d) -> (h b) n d'  (g = h*bt + b).
    # TODO(synk): a one-shot lane-minor reshape+transpose relayout
    # ((M,3D)->(3H,M,d)) is not reliably lowered by Mosaic inside kernels, so
    # the split stays as static 2D slices + a leading-axis stack; the scale
    # fold and the in-register lane-dense merge below remove the larger costs
    # flagged in review.
    def split(base):
        return jnp.stack(
            [qkv[b_i * n:(b_i + 1) * n, base + h * d: base + (h + 1) * d]
             for h in range(num_heads) for b_i in range(bt)],
            axis=0)                                              # (G, n, d)

    q = split(0)            # scale already folded into W_q
    k = split(dim)
    v = split(2 * dim)

    # --- batched scores over (head, batch) on the MXU: transposed-RHS form,
    # no materialized K^T (same contraction the reference flash kernel uses).
    dots = jnp.einsum('gqd,gkd->gqk', q, k,
                      preferred_element_type=jnp.float32)        # (G, n, n) f32

    # Numerically-stable softmax; exp optionally in bf16 (v6e/v7x EUP rate);
    # normalization deferred past the PV matmul, denominator summed in f32.
    m_max = jnp.max(dots, axis=-1, keepdims=True)
    p = jnp.exp((dots - m_max).astype(exp_dtype))
    denom = jnp.sum(p.astype(jnp.float32), axis=-1, keepdims=True)

    out_h = jnp.einsum('gqk,gkd->gqd', p.astype(in_dt), v,
                       preferred_element_type=jnp.float32)       # (G, n, d) f32
    # Exact (non-approx) reciprocal: O(G*n) elements, negligible cost, keeps
    # parity with the reference softmax.
    out_h = (out_h * pl.reciprocal(denom)).astype(in_dt)

    # Merge '(h b) n d -> (b n) (h d)' fully in registers: per batch row a
    # lane-dim concat of the head outputs, then a sublane concat of the rows.
    # No VMEM slab, no masked narrow stores, no store->load round trip.
    rows = [jnp.concatenate([out_h[h * bt + b_i] for h in range(num_heads)],
                            axis=-1)                              # (n, D)
            for b_i in range(bt)]
    merged = jnp.concatenate(rows, axis=0)                        # (M, D)

    # --- output projection with bias (K = D fused), f32 accumulation, and a
    # lane-dense (M, D) output store.
    out = jnp.dot(merged, wproj_ref[...],
                  preferred_element_type=jnp.float32) + bproj_ref[...]
    o_ref[...] = out.astype(o_ref.dtype)


def attention_forward(x, w_qkv, w_proj, b_proj, num_heads, softmax_exp_dtype=None):
    """x: (B, N, D); w_qkv: (3D, D); w_proj: (D, D); b_proj: (D,).

    Weights use PyTorch (out_features, in_features) layout; they are
    pre-transposed (and the softmax scale folded into W_q) here so bf16 models
    feed the MXU with bf16 inputs (accumulation stays f32 inside the kernel).
    """
    b, n, dim = x.shape
    assert dim % num_heads == 0
    head_dim = dim // num_heads
    scale = head_dim ** (-0.5)
    in_dt = x.dtype
    itemsize = jnp.dtype(in_dt).itemsize

    # Fold the softmax scale into the q output channels of W_qkv (rows [0:D)
    # in PyTorch (out, in) layout).  Exact: the qkv Linear has no bias.
    w_qkv = jnp.asarray(w_qkv)
    w_qkv = w_qkv.at[:dim].multiply(scale)
    wqkv_t = w_qkv.T.astype(in_dt)                                # (D, 3D)
    wproj_t = jnp.asarray(w_proj).T.astype(in_dt)                 # (D, D)
    bproj2 = jnp.asarray(b_proj).reshape(1, dim).astype(jnp.float32)

    if softmax_exp_dtype is None:
        # bf16 exp packs 2 elem/lane through the v6e/v7x EUP (~2x); pass
        # jnp.float32 explicitly for bf16 models on v5e (no bf16 EUP) or for
        # strict parity with the reference softmax.
        softmax_exp_dtype = jnp.bfloat16 if in_dt == jnp.bfloat16 else jnp.float32

    block_b = _pick_block_b(b, n, dim, num_heads, itemsize)
    m_block = block_b * n

    kernel = functools.partial(attention_kernel, num_heads=num_heads,
                               seq_len=n, exp_dtype=softmax_exp_dtype)

    flops = 2 * b * (n * dim * 3 * dim                            # qkv projection
                     + 2 * num_heads * n * n * head_dim           # QK^T + PV
                     + n * dim * dim)                             # output projection
    transcendentals = b * num_heads * n * n                       # softmax exp
    bytes_accessed = (x.size * itemsize + wqkv_t.size * itemsize
                      + wproj_t.size * itemsize + bproj2.size * 4
                      + b * n * dim * itemsize)

    # Flatten (b, n) in the wrapper (free, layout-preserving) so the kernel and
    # its output store see lane-dense 2D (M, D) blocks.
    x2 = x.reshape(b * n, dim)

    # NOTE: for long sequences (H*N^2 f32 scores approaching the working-set
    # budget, i.e. N >~ 500 for H=12 -- relevant mainly on v7x's 64 MiB VMEM),
    # this whole-sequence-per-step design should become a flash-style q/kv
    # tiled grid (running m/l/acc scratch, kv axis "arbitrary", q axis
    # "parallel").  ViT-scale shapes targeted here fit comfortably.
    out2 = pl.pallas_call(
        kernel,
        out_shape=jax.ShapeDtypeStruct((b * n, dim), in_dt),
        grid_spec=pltpu.PrefetchScalarGridSpec(
            num_scalar_prefetch=0,
            grid=(b // block_b,),
            in_specs=[
                pl.BlockSpec((m_block, dim), lambda i: (i, 0)),   # x rows
                # Grid-invariant weights: constant index_map -> fetched once.
                # TODO(synk): single-buffer these (pipeline_mode=pl.Buffered(1))
                # once confirmed supported by this jax version's pallas_call
                # pipeliner; saves ~1x the weight footprint of VMEM on v7x.
                pl.BlockSpec((dim, 3 * dim), lambda i: (0, 0)),   # W_qkv^T (whole)
                pl.BlockSpec((dim, dim), lambda i: (0, 0)),       # W_proj^T (whole)
                pl.BlockSpec((1, dim), lambda i: (0, 0)),         # b_proj
            ],
            out_specs=pl.BlockSpec((m_block, dim), lambda i: (i, 0)),
        ),
        compiler_params=pltpu.CompilerParams(
            dimension_semantics=("parallel",),
            vmem_limit_bytes=_vmem_limit_bytes(block_b, n, dim, num_heads,
                                               itemsize),
        ),
        cost_estimate=pl.CostEstimate(
            flops=flops,
            transcendentals=transcendentals,
            bytes_accessed=bytes_accessed),
    )(x2, wqkv_t, wproj_t, bproj2)

    return out2.reshape(b, n, dim)


def attention_reference(x, w_qkv, w_proj, b_proj, num_heads):
    """Pure-JAX reference mirroring the PyTorch forward exactly."""
    b, n, dim = x.shape
    d = dim // num_heads
    scale = d ** (-0.5)
    qkv = jnp.einsum('bnd,od->bno', x, w_qkv)                 # Linear, no bias
    qkv = qkv.reshape(b, n, 3, num_heads, d)
    qkv = jnp.transpose(qkv, (2, 0, 3, 1, 4))                 # (3, b, h, n, d)
    q, k, v = qkv[0], qkv[1], qkv[2]
    dots = jnp.einsum('bhid,bhjd->bhij', q, k) * scale
    attn = jax.nn.softmax(dots, axis=-1)
    out = jnp.einsum('bhij,bhjd->bhid', attn, v)
    out = jnp.transpose(out, (0, 2, 1, 3)).reshape(b, n, dim)  # 'b h n d -> b n (h d)'
    out = jnp.einsum('bnd,od->bno', out, w_proj) + b_proj
    return out


if __name__ == "__main__":
    # Small but lane-aligned shapes: DIM % 128 == 0, N % 8 == 0.
    B, N, DIM, HEADS = 2, 16, 128, 4

    key = jax.random.PRNGKey(0)
    kx, kq, kp, kb = jax.random.split(key, 4)

    x = jax.random.normal(kx, (B, N, DIM), dtype=jnp.float32)
    # PyTorch weight layout: (out_features, in_features)
    w_qkv = jax.random.normal(kq, (3 * DIM, DIM), dtype=jnp.float32) * 0.1
    w_proj = jax.random.normal(kp, (DIM, DIM), dtype=jnp.float32) * 0.1
    b_proj = jax.random.normal(kb, (DIM,), dtype=jnp.float32) * 0.1

    out = attention_forward(x, w_qkv, w_proj, b_proj, HEADS)
    out = jax.block_until_ready(out)

    ref = attention_reference(x, w_qkv, w_proj, b_proj, HEADS)
    # f32 end-to-end; tolerance slack covers MXU default-precision differences
    # between the XLA reference einsums and the in-kernel f32-accumulating
    # matmuls (the softmax normalization is now exact).
    np.testing.assert_allclose(np.asarray(out), np.asarray(ref),
                               rtol=2e-2, atol=2e-2)
    print("KERNEL_OK")
</pallas_src>

<mosaic_0001>
module attributes {stable_mosaic.version = 11 : i64} {
  func.func @attention_kernel(%arg0: i32, %arg1: memref<32x128xf32, #tpu.memory_space<vmem>>, %arg2: memref<128x384xf32, #tpu.memory_space<vmem>>, %arg3: memref<128x128xf32, #tpu.memory_space<vmem>>, %arg4: memref<1x128xf32, #tpu.memory_space<vmem>>, %arg5: memref<32x128xf32, #tpu.memory_space<vmem>>) attributes {dimension_semantics = [#tpu.dimension_semantics<parallel>], iteration_bounds = array<i64: 1>, scalar_prefetch = 0 : i64, scratch_operands = 0 : i64, tpu.core_type = #tpu.core_type<tc>, window_params = [{transform_indices = @transform_0, window_bounds = array<i64: 32, 128>}, {pipeline_mode = #tpu.pipeline_mode<synchronous>, transform_indices = @transform_1, window_bounds = array<i64: 128, 384>}, {pipeline_mode = #tpu.pipeline_mode<synchronous>, transform_indices = @transform_2, window_bounds = array<i64: 128, 128>}, {pipeline_mode = #tpu.pipeline_mode<synchronous>, transform_indices = @transform_3, window_bounds = array<i64: 1, 128>}, {transform_indices = @transform_4, window_bounds = array<i64: 32, 128>}]} {
    %c0 = arith.constant 0 : index
    %c0_0 = arith.constant 0 : index
    %0 = vector.load %arg1[%c0, %c0_0] : memref<32x128xf32, #tpu.memory_space<vmem>>, vector<32x128xf32>
    %c0_1 = arith.constant 0 : index
    %c0_2 = arith.constant 0 : index
    %1 = vector.load %arg2[%c0_1, %c0_2] : memref<128x384xf32, #tpu.memory_space<vmem>>, vector<128x384xf32>
    %cst = arith.constant dense<0.000000e+00> : vector<32x384xf32>
    %2 = tpu.matmul %0, %1, %cst {dimension_numbers = #tpu.dot_dimension_numbers<[1], [0], [0], [1], [0, 0, 1, 1], [], []>} : vector<32x128xf32>, vector<128x384xf32>, vector<32x384xf32> -> vector<32x384xf32>
    %3 = vector.extract_strided_slice %2 {offsets = [0, 0], sizes = [16, 32], strides = [1, 1]} : vector<32x384xf32> to vector<16x32xf32>
    %4 = vector.extract_strided_slice %2 {offsets = [16, 0], sizes = [16, 32], strides = [1, 1]} : vector<32x384xf32> to vector<16x32xf32>
    %5 = vector.extract_strided_slice %2 {offsets = [0, 32], sizes = [16, 32], strides = [1, 1]} : vector<32x384xf32> to vector<16x32xf32>
    %6 = vector.extract_strided_slice %2 {offsets = [16, 32], sizes = [16, 32], strides = [1, 1]} : vector<32x384xf32> to vector<16x32xf32>
    %7 = vector.extract_strided_slice %2 {offsets = [0, 64], sizes = [16, 32], strides = [1, 1]} : vector<32x384xf32> to vector<16x32xf32>
    %8 = vector.extract_strided_slice %2 {offsets = [16, 64], sizes = [16, 32], strides = [1, 1]} : vector<32x384xf32> to vector<16x32xf32>
    %9 = vector.extract_strided_slice %2 {offsets = [0, 96], sizes = [16, 32], strides = [1, 1]} : vector<32x384xf32> to vector<16x32xf32>
    %10 = vector.extract_strided_slice %2 {offsets = [16, 96], sizes = [16, 32], strides = [1, 1]} : vector<32x384xf32> to vector<16x32xf32>
    %11 = vector.shape_cast %3 : vector<16x32xf32> to vector<1x16x32xf32>
    %12 = vector.shape_cast %4 : vector<16x32xf32> to vector<1x16x32xf32>
    %13 = vector.shape_cast %5 : vector<16x32xf32> to vector<1x16x32xf32>
    %14 = vector.shape_cast %6 : vector<16x32xf32> to vector<1x16x32xf32>
    %15 = vector.shape_cast %7 : vector<16x32xf32> to vector<1x16x32xf32>
    %16 = vector.shape_cast %8 : vector<16x32xf32> to vector<1x16x32xf32>
    %17 = vector.shape_cast %9 : vector<16x32xf32> to vector<1x16x32xf32>
    %18 = vector.shape_cast %10 : vector<16x32xf32> to vector<1x16x32xf32>
    %19 = tpu.concatenate %11, %12, %13, %14, %15, %16, %17, %18 in 0 : vector<1x16x32xf32>, vector<1x16x32xf32>, vector<1x16x32xf32>, vector<1x16x32xf32>, vector<1x16x32xf32>, vector<1x16x32xf32>, vector<1x16x32xf32>, vector<1x16x32xf32> -> vector<8x16x32xf32>
    %20 = vector.extract_strided_slice %2 {offsets = [0, 128], sizes = [16, 32], strides = [1, 1]} : vector<32x384xf32> to vector<16x32xf32>
    %21 = vector.extract_strided_slice %2 {offsets = [16, 128], sizes = [16, 32], strides = [1, 1]} : vector<32x384xf32> to vector<16x32xf32>
    %22 = vector.extract_strided_slice %2 {offsets = [0, 160], sizes = [16, 32], strides = [1, 1]} : vector<32x384xf32> to vector<16x32xf32>
    %23 = vector.extract_strided_slice %2 {offsets = [16, 160], sizes = [16, 32], strides = [1, 1]} : vector<32x384xf32> to vector<16x32xf32>
    %24 = vector.extract_strided_slice %2 {offsets = [0, 192], sizes = [16, 32], strides = [1, 1]} : vector<32x384xf32> to vector<16x32xf32>
    %25 = vector.extract_strided_slice %2 {offsets = [16, 192], sizes = [16, 32], strides = [1, 1]} : vector<32x384xf32> to vector<16x32xf32>
    %26 = vector.extract_strided_slice %2 {offsets = [0, 224], sizes = [16, 32], strides = [1, 1]} : vector<32x384xf32> to vector<16x32xf32>
    %27 = vector.extract_strided_slice %2 {offsets = [16, 224], sizes = [16, 32], strides = [1, 1]} : vector<32x384xf32> to vector<16x32xf32>
    %28 = vector.shape_cast %20 : vector<16x32xf32> to vector<1x16x32xf32>
    %29 = vector.shape_cast %21 : vector<16x32xf32> to vector<1x16x32xf32>
    %30 = vector.shape_cast %22 : vector<16x32xf32> to vector<1x16x32xf32>
    %31 = vector.shape_cast %23 : vector<16x32xf32> to vector<1x16x32xf32>
    %32 = vector.shape_cast %24 : vector<16x32xf32> to vector<1x16x32xf32>
    %33 = vector.shape_cast %25 : vector<16x32xf32> to vector<1x16x32xf32>
    %34 = vector.shape_cast %26 : vector<16x32xf32> to vector<1x16x32xf32>
    %35 = vector.shape_cast %27 : vector<16x32xf32> to vector<1x16x32xf32>
    %36 = tpu.concatenate %28, %29, %30, %31, %32, %33, %34, %35 in 0 : vector<1x16x32xf32>, vector<1x16x32xf32>, vector<1x16x32xf32>, vector<1x16x32xf32>, vector<1x16x32xf32>, vector<1x16x32xf32>, vector<1x16x32xf32>, vector<1x16x32xf32> -> vector<8x16x32xf32>
    %37 = vector.extract_strided_slice %2 {offsets = [0, 256], sizes = [16, 32], strides = [1, 1]} : vector<32x384xf32> to vector<16x32xf32>
    %38 = vector.extract_strided_slice %2 {offsets = [16, 256], sizes = [16, 32], strides = [1, 1]} : vector<32x384xf32> to vector<16x32xf32>
    %39 = vector.extract_strided_slice %2 {offsets = [0, 288], sizes = [16, 32], strides = [1, 1]} : vector<32x384xf32> to vector<16x32xf32>
    %40 = vector.extract_strided_slice %2 {offsets = [16, 288], sizes = [16, 32], strides = [1, 1]} : vector<32x384xf32> to vector<16x32xf32>
    %41 = vector.extract_strided_slice %2 {offsets = [0, 320], sizes = [16, 32], strides = [1, 1]} : vector<32x384xf32> to vector<16x32xf32>
    %42 = vector.extract_strided_slice %2 {offsets = [16, 320], sizes = [16, 32], strides = [1, 1]} : vector<32x384xf32> to vector<16x32xf32>
    %43 = vector.extract_strided_slice %2 {offsets = [0, 352], sizes = [16, 32], strides = [1, 1]} : vector<32x384xf32> to vector<16x32xf32>
    %44 = vector.extract_strided_slice %2 {offsets = [16, 352], sizes = [16, 32], strides = [1, 1]} : vector<32x384xf32> to vector<16x32xf32>
    %45 = vector.shape_cast %37 : vector<16x32xf32> to vector<1x16x32xf32>
    %46 = vector.shape_cast %38 : vector<16x32xf32> to vector<1x16x32xf32>
    %47 = vector.shape_cast %39 : vector<16x32xf32> to vector<1x16x32xf32>
    %48 = vector.shape_cast %40 : vector<16x32xf32> to vector<1x16x32xf32>
    %49 = vector.shape_cast %41 : vector<16x32xf32> to vector<1x16x32xf32>
    %50 = vector.shape_cast %42 : vector<16x32xf32> to vector<1x16x32xf32>
    %51 = vector.shape_cast %43 : vector<16x32xf32> to vector<1x16x32xf32>
    %52 = vector.shape_cast %44 : vector<16x32xf32> to vector<1x16x32xf32>
    %53 = tpu.concatenate %45, %46, %47, %48, %49, %50, %51, %52 in 0 : vector<1x16x32xf32>, vector<1x16x32xf32>, vector<1x16x32xf32>, vector<1x16x32xf32>, vector<1x16x32xf32>, vector<1x16x32xf32>, vector<1x16x32xf32>, vector<1x16x32xf32> -> vector<8x16x32xf32>
    "tpu.trace_start"() <{level = 10 : i32, message = "gqd,gkd->gqk"}> : () -> ()
    %cst_3 = arith.constant dense<0.000000e+00> : vector<8x16x16xf32>
    %54 = tpu.matmul %19, %36, %cst_3 {dimension_numbers = #tpu.dot_dimension_numbers<[2], [2], [1], [1], [0, 0, 0, 1, 1, 1], [0], [0]>} : vector<8x16x32xf32>, vector<8x16x32xf32>, vector<8x16x16xf32> -> vector<8x16x16xf32>
    "tpu.trace_stop"() : () -> ()
    %cst_4 = arith.constant dense<0xFF800000> : vector<8x16xf32>
    %55 = vector.multi_reduction <maximumf>, %54, %cst_4 [2] : vector<8x16x16xf32> to vector<8x16xf32>
    %56 = vector.shape_cast %55 : vector<8x16xf32> to vector<8x16x1xf32>
    %57 = vector.broadcast %56 : vector<8x16x1xf32> to vector<8x16x16xf32>
    %58 = arith.subf %54, %57 : vector<8x16x16xf32>
    %59 = math.exp %58 : vector<8x16x16xf32>
    %cst_5 = arith.constant dense<0.000000e+00> : vector<8x16xf32>
    %60 = vector.multi_reduction <add>, %59, %cst_5 [2] : vector<8x16x16xf32> to vector<8x16xf32>
    %61 = vector.shape_cast %60 : vector<8x16xf32> to vector<8x16x1xf32>
    "tpu.trace_start"() <{level = 10 : i32, message = "gqk,gkd->gqd"}> : () -> ()
    %cst_6 = arith.constant dense<0.000000e+00> : vector<8x16x32xf32>
    %62 = tpu.matmul %59, %53, %cst_6 {dimension_numbers = #tpu.dot_dimension_numbers<[2], [1], [1], [2], [0, 0, 0, 1, 1, 2], [0], [0]>} : vector<8x16x16xf32>, vector<8x16x32xf32>, vector<8x16x32xf32> -> vector<8x16x32xf32>
    "tpu.trace_stop"() : () -> ()
    %63 = tpu.reciprocal %61 : vector<8x16x1xf32> -> vector<8x16x1xf32>
    %64 = vector.broadcast %63 : vector<8x16x1xf32> to vector<8x16x32xf32>
    %65 = arith.mulf %62, %64 : vector<8x16x32xf32>
    %66 = vector.extract_strided_slice %65 {offsets = [0, 0, 0], sizes = [1, 16, 32], strides = [1, 1, 1]} : vector<8x16x32xf32> to vector<1x16x32xf32>
    %67 = vector.shape_cast %66 : vector<1x16x32xf32> to vector<16x32xf32>
    %68 = vector.extract_strided_slice %65 {offsets = [2, 0, 0], sizes = [1, 16, 32], strides = [1, 1, 1]} : vector<8x16x32xf32> to vector<1x16x32xf32>
    %69 = vector.shape_cast %68 : vector<1x16x32xf32> to vector<16x32xf32>
    %70 = vector.extract_strided_slice %65 {offsets = [4, 0, 0], sizes = [1, 16, 32], strides = [1, 1, 1]} : vector<8x16x32xf32> to vector<1x16x32xf32>
    %71 = vector.shape_cast %70 : vector<1x16x32xf32> to vector<16x32xf32>
    %72 = vector.extract_strided_slice %65 {offsets = [6, 0, 0], sizes = [1, 16, 32], strides = [1, 1, 1]} : vector<8x16x32xf32> to vector<1x16x32xf32>
    %73 = vector.shape_cast %72 : vector<1x16x32xf32> to vector<16x32xf32>
    %74 = tpu.concatenate %67, %69, %71, %73 in 1 : vector<16x32xf32>, vector<16x32xf32>, vector<16x32xf32>, vector<16x32xf32> -> vector<16x128xf32>
    %75 = vector.extract_strided_slice %65 {offsets = [1, 0, 0], sizes = [1, 16, 32], strides = [1, 1, 1]} : vector<8x16x32xf32> to vector<1x16x32xf32>
    %76 = vector.shape_cast %75 : vector<1x16x32xf32> to vector<16x32xf32>
    %77 = vector.extract_strided_slice %65 {offsets = [3, 0, 0], sizes = [1, 16, 32], strides = [1, 1, 1]} : vector<8x16x32xf32> to vector<1x16x32xf32>
    %78 = vector.shape_cast %77 : vector<1x16x32xf32> to vector<16x32xf32>
    %79 = vector.extract_strided_slice %65 {offsets = [5, 0, 0], sizes = [1, 16, 32], strides = [1, 1, 1]} : vector<8x16x32xf32> to vector<1x16x32xf32>
    %80 = vector.shape_cast %79 : vector<1x16x32xf32> to vector<16x32xf32>
    %81 = vector.extract_strided_slice %65 {offsets = [7, 0, 0], sizes = [1, 16, 32], strides = [1, 1, 1]} : vector<8x16x32xf32> to vector<1x16x32xf32>
    %82 = vector.shape_cast %81 : vector<1x16x32xf32> to vector<16x32xf32>
    %83 = tpu.concatenate %76, %78, %80, %82 in 1 : vector<16x32xf32>, vector<16x32xf32>, vector<16x32xf32>, vector<16x32xf32> -> vector<16x128xf32>
    %84 = tpu.concatenate %74, %83 in 0 : vector<16x128xf32>, vector<16x128xf32> -> vector<32x128xf32>
    %c0_7 = arith.constant 0 : index
    %c0_8 = arith.constant 0 : index
    %85 = vector.load %arg3[%c0_7, %c0_8] : memref<128x128xf32, #tpu.memory_space<vmem>>, vector<128x128xf32>
    %cst_9 = arith.constant dense<0.000000e+00> : vector<32x128xf32>
    %86 = tpu.matmul %84, %85, %cst_9 {dimension_numbers = #tpu.dot_dimension_numbers<[1], [0], [0], [1], [0, 0, 1, 1], [], []>} : vector<32x128xf32>, vector<128x128xf32>, vector<32x128xf32> -> vector<32x128xf32>
    %c0_10 = arith.constant 0 : index
    %c0_11 = arith.constant 0 : index
    %87 = vector.load %arg4[%c0_10, %c0_11] : memref<1x128xf32, #tpu.memory_space<vmem>>, vector<1x128xf32>
    %88 = vector.broadcast %87 : vector<1x128xf32> to vector<32x128xf32>
    %89 = arith.addf %86, %88 : vector<32x128xf32>
    %c0_12 = arith.constant 0 : index
    %c0_13 = arith.constant 0 : index
    %90 = vector.load %arg5[%c0_12, %c0_13] : memref<32x128xf32, #tpu.memory_space<vmem>>, vector<32x128xf32>
    tpu.vector_store %arg5[%c0_12, %c0_13], %89 {strides = array<i32>} : memref<32x128xf32, #tpu.memory_space<vmem>>, vector<32x128xf32>,
    return
  }
  func.func @transform_0(%arg0: i32) -> (i32, i32) {
    %c0_i32 = arith.constant 0 : i32
    %c0_i32_0 = arith.constant 0 : i32
    return %arg0, %c0_i32 : i32, i32
  }
  func.func @transform_1(%arg0: i32) -> (i32, i32) {
    %c0_i32 = arith.constant 0 : i32
    %c0_i32_0 = arith.constant 0 : i32
    %c0_i32_1 = arith.constant 0 : i32
    return %c0_i32, %c0_i32_0 : i32, i32
  }
  func.func @transform_2(%arg0: i32) -> (i32, i32) {
    %c0_i32 = arith.constant 0 : i32
    %c0_i32_0 = arith.constant 0 : i32
    %c0_i32_1 = arith.constant 0 : i32
    return %c0_i32, %c0_i32_0 : i32, i32
  }
  func.func @transform_3(%arg0: i32) -> (i32, i32) {
    %c0_i32 = arith.constant 0 : i32
    %c0_i32_0 = arith.constant 0 : i32
    %c0_i32_1 = arith.constant 0 : i32
    return %c0_i32, %c0_i32_0 : i32, i32
  }
  func.func @transform_4(%arg0: i32) -> (i32, i32) {
    %c0_i32 = arith.constant 0 : i32
    %c0_i32_0 = arith.constant 0 : i32
    return %arg0, %c0_i32 : i32, i32
  }
}

</mosaic_0001>

<bundles_post_ra>
// kernel: tpu_custom_call.1
= control target key start
LH: loop header
LB: loop body
LE: loop exit
PB: predicated region body
PF: predicated region fallthrough
CT: control target
= control target key end

     0   :  { %9 = vsyncpa [#allocation3], 0  ;;  %s1981_s0 = inlined_call_operand.hbm [shape: f32[32,128], index: 0, kind: input, shape index: {}]   ;;  %s1982_s1 = inlined_call_operand.hbm [shape: f32[128,384], index: 1, kind: input, shape index: {}]   ;;  %s1983_s2 = inlined_call_operand.hbm [shape: f32[128,128], index: 2, kind: input, shape index: {}]   ;;  %s1984_s3 = inlined_call_operand.vmem [shape: f32[1,128], index: 3, kind: input, shape index: {}]   ;;  %s1985_s4 = inlined_call_operand.hbm [shape: f32[32,128], index: 4, kind: output, shape index: {}]  }
   0x1   :  { %10 = vsyncpa [#allocation6], 0  ;;  %s29_s17 = sshll.u32 %s1982_s1, 4  ;;  %s30_s17 = int_to_ptr.hbm [resolvable:$true] %s29_s17 }
   0x2   :  { %11 = vsyncpa [#allocation4], 0  ;;  %s1564_s18 = smov [#allocation5]   ;;  %s16_s22 = sshll.u32 %s1981_s0, 4  ;;  %s17_s22 = int_to_ptr.hbm [resolvable:$true] %s16_s22 }
   0x3   :  { %s31_s19 = sshll.u32 %s1564_s18, 4  ;;  %s1565_s23 = smov 384   ;;  %s32_s19 = int_to_ptr.vmem [resolvable:$true] %s31_s19 }
   0x4   :  { %s1566_s24 = smov 24   ;;  %s1567_s25 = smov [#allocation2]  }
   0x5   :  { %37 = dma.hbm_to_vmem [thread:$0]  %s30_s17, 6144, %s32_s19, [#allocation6], %s1565_s23, %s1565_s23, %s1566_s24  }
   0x6   :  { %s18_s26 = sshll.u32 %s1567_s25, 4  ;;  %s1568_s27 = smov 128   ;;  %s19_s26 = int_to_ptr.vmem [resolvable:$true] %s18_s26 }
   0x7   :  { %s1569_s28 = smov 8   ;;  %s42_s30 = sshll.u32 %s1983_s2, 4  ;;  %s43_s30 = int_to_ptr.hbm [resolvable:$true] %s42_s30 }
   0x8   :  { %24 = dma.hbm_to_vmem [thread:$0]  %s17_s22, 512, %s19_s26, [#allocation3], %s1568_s27, %s1568_s27, %s1569_s28  }
   0x9   :  { %s1570_s5 = smov [#allocation7]  }
   0xa   :  { %s44_s0 = sshll.u32 %s1570_s5, 4  ;;  %s45_s0 = int_to_ptr.vmem [resolvable:$true] %s44_s0 }
   0xb   :  { %50 = dma.hbm_to_vmem [thread:$0]  %s43_s30, 2048, %s45_s0, [#allocation6], %s1568_s27, %s1568_s27, %s1569_s28  }
   0xc   :  { %1558 = dma.done.wait [#allocation3], 512  }
   0xd   :  { %1559 = vsyncadd [#allocation3], 4294966784 }
   0xe   :  { %1560 = dma.done.wait [#allocation6], 8192  }
   0xf   :  { %1561 = vsyncadd [#allocation6], 4294959104  ;;  %v114_v0 = vld [vmem:[#allocation5 + $0x168] sm:$0xff]  ;;  %v111_v1 = vld [vmem:[#allocation5 + $0x150] sm:$0xff]  ;;  %s1571_s2 = smov 96   ;;  %s1572_s6 = smov 32  }
  0x10   :  { %117 = vmatpush.msra.mxu1 %v114_v0  ;;  %v108_v2 = vld [vmem:[#allocation5 + $0x138] sm:$0xff]  ;;  %v105_v3 = vld [vmem:[#allocation5 + $0x120] sm:$0xff]  ;;  %v102_v4 = vld [vmem:[#allocation5 + $0x108] sm:$0xff]  ;;  %vm300_vm0 = vcmask 261120   ;;  %s1573_s7 = smov 64   ;;  %vm549_vm1 = vcmask 130048  }
  0x11   :  { %v99_v5 = vld [vmem:[#allocation5 + $0xf0] sm:$0xff]  ;;  %v96_v6 = vld [vmem:[#allocation5 + $0xd8] sm:$0xff]  ;;  %v93_v7 = vld [vmem:[#allocation5 + $0xc0] sm:$0xff]  ;;  %s1574_s10 = smov [#allocation8]   ;;  %s1287_s14 = sshll.u32 %s1985_s4, 4  ;;  %s1288_s14 = int_to_ptr.hbm [resolvable:$true] %s1287_s14 }
  0x12   :  { %118 = vmatpush.msra.mxu1 %v111_v1  ;;  %v90_v8 = vld [vmem:[#allocation5 + $0xa8] sm:$0xff]  ;;  %v87_v9 = vld [vmem:[#allocation5 + $0x90] sm:$0xff]  ;;  %v84_v10 = vld [vmem:[#allocation5 + $0x78] sm:$0xff]  ;;  %s1285_s11 = sshll.u32 %s1574_s10, 4  ;;  %s1286_s11 = int_to_ptr.vmem [resolvable:$true] %s1285_s11 }
  0x13   :  { %v81_v11 = vld [vmem:[#allocation5 + $0x60] sm:$0xff]  ;;  %v78_v12 = vld [vmem:[#allocation5 + $0x48] sm:$0xff]  ;;  %v75_v13 = vld [vmem:[#allocation5 + $0x30] sm:$0xff] }
  0x14   :  { %119 = vmatpush.msra.mxu1 %v108_v2  ;;  %v72_v14 = vld [vmem:[#allocation5 + $0x18] sm:$0xff]  ;;  %v69_v15 = vld [vmem:[#allocation5] sm:$0xff]  ;;  %v115_v17 = vld [vmem:[#allocation5 + $0x170] sm:$0xff] }
  0x15   :  { %v1615_v16 = vld [vmem:[#allocation2] sm:$0xff]  ;;  %v112_v18 = vld [vmem:[#allocation5 + $0x158] sm:$0xff]  ;;  %v106_v20 = vld [vmem:[#allocation5 + $0x128] sm:$0xff] }
  0x16   :  { %120 = vmatpush.msra.mxu1 %v105_v3  ;;  %v109_v19 = vld [vmem:[#allocation5 + $0x140] sm:$0xff]  ;;  %v1618_v21 = vld [vmem:[#allocation2 + $0x8] sm:$0xff]  ;;  %v103_v22 = vld [vmem:[#allocation5 + $0x110] sm:$0xff] }
  0x17   :  { %v100_v23 = vld [vmem:[#allocation5 + $0xf8] sm:$0xff]  ;;  %v97_v24 = vld [vmem:[#allocation5 + $0xe0] sm:$0xff]  ;;  %v94_v25 = vld [vmem:[#allocation5 + $0xc8] sm:$0xff] }
  0x18   :  { %121 = vmatpush.msra.mxu1 %v102_v4  ;;  %v67_v26 = vld [vmem:[#allocation2 + $0x10] sm:$0xff]  ;;  %v88_v28 = vld [vmem:[#allocation5 + $0x98] sm:$0xff]  ;;  %v85_v29 = vld [vmem:[#allocation5 + $0x80] sm:$0xff] }
  0x19   :  { %v91_v27 = vld [vmem:[#allocation5 + $0xb0] sm:$0xff]  ;;  %v82_v30 = vld [vmem:[#allocation5 + $0x68] sm:$0xff]  ;;  %v68_v31 = vld [vmem:[#allocation2 + $0x18] sm:$0xff] }
  0x1a   :  { %122 = vmatpush.msra.mxu1 %v99_v5  ;;  %v79_v32 = vld [vmem:[#allocation5 + $0x50] sm:$0xff]  ;;  %v76_v33 = vld [vmem:[#allocation5 + $0x38] sm:$0xff]  ;;  %v113_v35 = vld [vmem:[#allocation5 + $0x160] sm:$0xff] }
  0x1b   :  { %v116_v34 = vld [vmem:[#allocation5 + $0x178] sm:$0xff]  ;;  %v73_v36 = vld [vmem:[#allocation5 + $0x20] sm:$0xff]  ;;  %v110_v37 = vld [vmem:[#allocation5 + $0x148] sm:$0xff] }
  0x1c   :  { %123 = vmatpush.msra.mxu1 %v96_v6  ;;  %175 = vmatpush.msra.mxu2 %v116_v34  ;;  %v70_v38 = vld [vmem:[#allocation5 + $0x8] sm:$0xff]  ;;  %v107_v39 = vld [vmem:[#allocation5 + $0x130] sm:$0xff]  ;;  %v104_v40 = vld [vmem:[#allocation5 + $0x118] sm:$0xff] }
  0x1d   :  { %v101_v41 = vld [vmem:[#allocation5 + $0x100] sm:$0xff]  ;;  %v98_v42 = vld [vmem:[#allocation5 + $0xe8] sm:$0xff]  ;;  %v95_v43 = vld [vmem:[#allocation5 + $0xd0] sm:$0xff] }
  0x1e   :  { %124 = vmatpush.msra.mxu1 %v93_v7  ;;  %176 = vmatpush.msra.mxu2 %v113_v35  ;;  %v92_v44 = vld [vmem:[#allocation5 + $0xb8] sm:$0xff]  ;;  %v89_v45 = vld [vmem:[#allocation5 + $0xa0] sm:$0xff]  ;;  %v86_v46 = vld [vmem:[#allocation5 + $0x88] sm:$0xff] }
  0x1f   :  { %v83_v47 = vld [vmem:[#allocation5 + $0x70] sm:$0xff]  ;;  %v80_v48 = vld [vmem:[#allocation5 + $0x58] sm:$0xff]  ;;  %v77_v49 = vld [vmem:[#allocation5 + $0x40] sm:$0xff] }
  0x20   :  { %125 = vmatpush.msra.mxu1 %v90_v8  ;;  %177 = vmatpush.msra.mxu2 %v110_v37  ;;  %v74_v50 = vld [vmem:[#allocation5 + $0x28] sm:$0xff]  ;;  %v71_v51 = vld [vmem:[#allocation5 + $0x10] sm:$0xff] }
  0x22   :  { %126 = vmatpush.msra.mxu1 %v87_v9  ;;  %178 = vmatpush.msra.mxu2 %v107_v39 }
  0x24   :  { %127 = vmatpush.msra.mxu1 %v84_v10  ;;  %179 = vmatpush.msra.mxu2 %v104_v40 }
  0x26   :  { %128 = vmatpush.msra.mxu1 %v81_v11  ;;  %180 = vmatpush.msra.mxu2 %v101_v41 }
  0x28   :  { %129 = vmatpush.msra.mxu1 %v78_v12  ;;  %181 = vmatpush.msra.mxu2 %v98_v42 }
  0x2a   :  { %130 = vmatpush.msra.mxu1 %v75_v13  ;;  %182 = vmatpush.msra.mxu2 %v95_v43 }
  0x2c   :  { %131 = vmatpush.msra.mxu1 %v72_v14  ;;  %183 = vmatpush.msra.mxu2 %v92_v44 }
  0x2e   :  { %132 = vmatpush.msra.mxu1 %v69_v15  ;;  %184 = vmatpush.msra.mxu2 %v89_v45 }
  0x2f   :  { %133 = vmatmul.f32.vlgmr.msra.gmra.mxu1 %v1615_v16 }
  0x30   :  { %146 = vmatpush.msrb.mxu1 %v115_v17  ;;  %185 = vmatpush.msra.mxu2 %v86_v46 }
  0x32   :  { %147 = vmatpush.msrb.mxu1 %v112_v18  ;;  %186 = vmatpush.msra.mxu2 %v83_v47 }
  0x34   :  { %148 = vmatpush.msrb.mxu1 %v109_v19  ;;  %187 = vmatpush.msra.mxu2 %v80_v48 }
  0x36   :  { %149 = vmatpush.msrb.mxu1 %v106_v20  ;;  %188 = vmatpush.msra.mxu2 %v77_v49 }
  0x37   :  { %136 = vmatmul.f32.gmra.mxu1 %v1618_v21 }
  0x38   :  { %150 = vmatpush.msrb.mxu1 %v103_v22  ;;  %189 = vmatpush.msra.mxu2 %v74_v50 }
  0x3a   :  { %151 = vmatpush.msrb.mxu1 %v100_v23  ;;  %190 = vmatpush.msra.mxu2 %v71_v51 }
  0x3b   :  { %191 = vmatmul.f32.vlgmr.msra.gmra.mxu2 %v1615_v16 }
  0x3c   :  { %152 = vmatpush.msrb.mxu1 %v97_v24 }
  0x3e   :  { %153 = vmatpush.msrb.mxu1 %v94_v25 }
  0x3f   :  { %139 = vmatmul.f32.gmra.mxu1 %v67_v26 }
  0x40   :  { %154 = vmatpush.msrb.mxu1 %v91_v27 }
  0x42   :  { %155 = vmatpush.msrb.mxu1 %v88_v28 }
  0x43   :  { %194 = vmatmul.f32.gmra.mxu2 %v1618_v21 }
  0x44   :  { %156 = vmatpush.msrb.mxu1 %v85_v29 }
  0x46   :  { %157 = vmatpush.msrb.mxu1 %v82_v30 }
  0x47   :  { %142 = vmatmul.f32.gmra.mxu1 %v68_v31 }
  0x48   :  { %158 = vmatpush.msrb.mxu1 %v79_v32 }
  0x4a   :  { %159 = vmatpush.msrb.mxu1 %v76_v33 }
  0x4b   :  { %197 = vmatmul.f32.gmra.mxu2 %v67_v26 }
  0x4c   :  { %160 = vmatpush.msrb.mxu1 %v73_v36 }
  0x4e   :  { %161 = vmatpush.msrb.mxu1 %v70_v38 }
  0x4f   :  { %162 = vmatmul.f32.vlgmr.msrb.gmra.mxu1 %v1615_v16 }
  0x53   :  { %200 = vmatmul.f32.gmra.mxu2 %v68_v31 }
  0x57   :  { %165 = vmatmul.f32.gmra.mxu1 %v1618_v21 }
  0x5f   :  { %168 = vmatmul.f32.gmra.mxu1 %v67_v26 }
  0x67   :  { %171 = vmatmul.f32.gmra.mxu1 %v68_v31 }
  0xac   :  { %v134_v52 = vpop.f32.mrf.mxu1 }
  0xad   :  { %206 = vrot.lane.b32.xlu1 %v134_v52, %s1571_s2 }
  0xb4   :  { %v137_v53 = vpop.f32.mrf.mxu1 }
  0xb5   :  { %208 = vrot.lane.b32.xlu1 %v137_v53, %s1571_s2 }
  0xbc   :  { %v140_v54 = vpop.f32.mrf.mxu1 }
  0xbd   :  { %212 = vrot.lane.b32.xlu2 %v140_v54, %s1571_s2 }
  0xbe   :  { %v1652_v60 = vpop.f32.mrf.mxu2 }
  0xc4   :  { %v143_v55 = vpop.f32.mrf.mxu1 }
  0xc6   :  { %v1656_v61 = vpop.f32.mrf.mxu2 }
  0xc7   :  { %v1667_v1 = vpack.i.bf16 %v1652_v60, %v1656_v61 }
  0xcc   :  { %v163_v56 = vpop.f32.mrf.mxu1 }
  0xcd   :  { %252 = vrot.lane.b32.xlu1 %v163_v56, %s1572_s6  ;;  %234 = vrot.lane.b32.xlu0 %v163_v56, %s1571_s2 }
  0xce   :  { %v198_v62 = vpop.f32.mrf.mxu2 }
  0xd4   :  { %v166_v57 = vpop.f32.mrf.mxu1 }
  0xd5   :  { %246 = vrot.lane.b32.xlu1 %v166_v57, %s1573_s7  ;;  %254 = vrot.lane.b32.xlu2 %v166_v57, %s1572_s6 }
  0xd6   :  { %236 = vrot.lane.b32.xlu0 %v166_v57, %s1571_s2  ;;  %1301 = vmatpush.xpose.msk.msra.mxu3 %vm300_vm0, %v166_v57  ;;  %v201_v63 = vpop.f32.mrf.mxu2 }
  0xd7   :  { %743 = vmatpush.msra.mxu1 %v201_v63  ;;  %v1661_v0 = vpack.i.bf16 %v198_v62, %v201_v63 }
  0xd9   :  { %744 = vmatpush.msra.mxu1 %v198_v62 }
  0xda   :  { %1302 = vmatpush.xpose.msk.msra.mxu3 %vm300_vm0, %v163_v56 }
  0xdc   :  { %v169_v58 = vpop.f32.mrf.mxu1 }
  0xdd   :  { %1303 = vmatmul.msk.f32.vlgmr.msra.gmra.mxu3 %vm300_vm0, %v134_v52  ;;  %244 = vrot.lane.b32.xlu1 %v163_v56, %s1573_s7 }
  0xde   :  { %224 = vrot.lane.b32.xlu0 %v134_v52, %s1572_s6 }
  0xe4   :  { %v172_v59 = vpop.f32.mrf.mxu1 }
  0xe5   :  { %1304 = vmatmul.msk.f32.gmra.mxu3 %vm300_vm0, %v137_v53  ;;  %256 = vrot.lane.b32.xlu1 %v169_v58, %s1572_s6 }
  0xe6   :  { %240 = vrot.lane.b32.xlu0 %v169_v58, %s1571_s2  ;;  %242 = vrot.lane.b32.xlu2 %v172_v59, %s1571_s2 }
  0xe7   :  { %1305 = vmatpush.xpose.msk.msrb.mxu3 %vm300_vm0, %v172_v59 }
  0xeb   :  { %1306 = vmatpush.xpose.msk.msrb.mxu3 %vm300_vm0, %v169_v58 }
  0xed   :  { %250 = vrot.lane.b32.xlu1 %v172_v59, %s1573_s7 }
  0xee   :  { %1307 = vmatmul.msk.f32.vlgmr.msrb.gmra.mxu3 %vm300_vm0, %v140_v54  ;;  %226 = vrot.lane.b32.xlu0 %v137_v53, %s1572_s6 }
  0xef   :  { %214 = vrot.lane.b32.xlu2 %v143_v55, %s1571_s2 }
  0xf5   :  { %220 = vrot.lane.b32.xlu1 %v140_v54, %s1573_s7 }
  0xf6   :  { %1308 = vmatmul.msk.f32.gmra.mxu3 %vm300_vm0, %v143_v55  ;;  %216 = vrot.lane.b32.xlu0 %v134_v52, %s1573_s7 }
  0xf7   :  { %258 = vrot.lane.b32.xlu2 %v172_v59, %s1572_s6 }
  0xfd   :  { %1373 = vrot.lane.b32.xlu1 %v1667_v1, %s1572_s6 }
  0xfe   :  { %218 = vrot.lane.b32.xlu0 %v137_v53, %s1573_s7 }
  0xff   :  { %228 = vrot.lane.b32.xlu2 %v140_v54, %s1572_s6 }
 0x106   :  { %248 = vrot.lane.b32.xlu0 %v169_v58, %s1573_s7 }
 0x107   :  { %230 = vrot.lane.b32.xlu2 %v143_v55, %s1572_s6 }
 0x10e   :  { %1363 = vrot.lane.b32.xlu0 %v1667_v1, %s1571_s2 }
 0x10f   :  { %222 = vrot.lane.b32.xlu2 %v143_v55, %s1573_s7 }
 0x117   :  { %1368 = vrot.lane.b32.xlu2 %v1661_v0, %s1571_s2  ;;  %v213_v2 = vpop.permute.xlu2 %212 }
 0x11f   :  { %v207_v3 = vpop.permute.xlu1 %206 }
 0x127   :  { %v209_v5 = vpop.permute.xlu1 %208 }
 0x12f   :  { %v255_v4 = vpop.permute.xlu2 %254 }
 0x130   :  { %1325 = vmatpush.xpose.msk.msrb.mxu2 %vm300_vm0, %v255_v4 }
 0x13f   :  { %v253_v6 = vpop.permute.xlu1 %252  ;;  %v235_v7 = vpop.permute.xlu0 %234 }
 0x140   :  { %v243_v8 = vpop.permute.xlu2 %242  ;;  %1326 = vmatpush.xpose.msk.msrb.mxu2 %vm300_vm0, %v253_v6 }
 0x144   :  { %1349 = vmatpush.msra.mxu2 %v201_v63 }
 0x146   :  { %1350 = vmatpush.msra.mxu2 %v198_v62 }
 0x147   :  { %v247_v9 = vpop.permute.xlu1 %246 }
 0x148   :  { %v237_v10 = vpop.permute.xlu0 %236  ;;  %1317 = vmatpush.xpose.msk.msra.mxu0 %vm300_vm0, %v247_v9 }
 0x149   :  { %v215_v11 = vpop.permute.xlu2 %214  ;;  %1309 = vmatpush.xpose.msk.msra.mxu3 %vm300_vm0, %v237_v10 }
 0x14d   :  { %1310 = vmatpush.xpose.msk.msra.mxu3 %vm300_vm0, %v235_v7 }
 0x14f   :  { %v245_v12 = vpop.permute.xlu1 %244 }
 0x150   :  { %v225_v13 = vpop.permute.xlu0 %224  ;;  %1311 = vmatmul.msk.f32.vlgmr.msra.gmra.mxu3 %vm300_vm0, %v207_v3  ;;  %1318 = vmatpush.xpose.msk.msra.mxu0 %vm300_vm0, %v245_v12 }
 0x151   :  { %1313 = vmatpush.xpose.msk.msrb.mxu3 %vm300_vm0, %v243_v8  ;;  %v259_v14 = vpop.permute.xlu2 %258  ;;  %1327 = vmatmul.msk.f32.vlgmr.msrb.gmra.mxu2 %vm300_vm0, %v225_v13 }
 0x157   :  { %v257_v15 = vpop.permute.xlu1 %256 }
 0x158   :  { %v241_v16 = vpop.permute.xlu0 %240  ;;  %1312 = vmatmul.msk.f32.gmra.mxu3 %vm300_vm0, %v209_v5 }
 0x159   :  { %v229_v17 = vpop.permute.xlu2 %228  ;;  %1314 = vmatpush.xpose.msk.msrb.mxu3 %vm300_vm0, %v241_v16 }
 0x15d   :  { %1329 = vmatpush.xpose.msk.msra.mxu3 %vm300_vm0, %v259_v14 }
 0x15f   :  { %v251_v18 = vpop.permute.xlu1 %250 }
 0x160   :  { %v326_v19 = vpop.f32.mrf.mxu3  ;;  %v227_v20 = vpop.permute.xlu0 %226  ;;  %1315 = vmatmul.msk.f32.vlgmr.msrb.gmra.mxu3 %vm300_vm0, %v213_v2  ;;  %1321 = vmatpush.xpose.msk.msrb.mxu0 %vm300_vm0, %v251_v18 }
 0x161   :  { %1330 = vmatpush.xpose.msk.msra.mxu3 %vm300_vm0, %v257_v15  ;;  %v231_v21 = vpop.permute.xlu2 %230  ;;  %1328 = vmatmul.msk.f32.gmra.mxu2 %vm300_vm0, %v227_v20  ;;  %v550_v22 = vsel %vm549_vm1, %v326_v19, -inf }
 0x162   :  { %551 = vmax.xlane.f32.xlu2 %v550_v22 }
 0x167   :  { %v221_v36 = vpop.permute.xlu1 %220 }
 0x168   :  { %v329_v23 = vpop.f32.mrf.mxu3  ;;  %v217_v24 = vpop.permute.xlu0 %216  ;;  %1316 = vmatmul.msk.f32.gmra.mxu3 %vm300_vm0, %v215_v11 }
 0x169   :  { %v223_v25 = vpop.permute.xlu2 %222  ;;  %1319 = vmatmul.msk.f32.vlgmr.msra.gmra.mxu0 %vm300_vm0, %v217_v24  ;;  %v553_v26 = vsel %vm549_vm1, %v329_v23, -inf }
 0x16a   :  { %554 = vmax.xlane.f32.xlu1 %v553_v26 }
 0x16f   :  { %v1374_v41 = vpop.permute.xlu1 %1373 }
 0x170   :  { %v219_v27 = vpop.permute.xlu0 %218  ;;  %1331 = vmatmul.msk.f32.vlgmr.msra.gmra.mxu3 %vm300_vm0, %v229_v17  ;;  %v1375_v9 = vunpack.i.l.bf16 %v1374_v41  ;;  %v1376_v13 = vunpack.i.h.bf16 %v1374_v41 }
 0x171   :  { %v357_v28 = vpop.f32.mrf.mxu3  ;;  %1320 = vmatmul.msk.f32.gmra.mxu0 %vm300_vm0, %v219_v27  ;;  %v1369_v29 = vpop.permute.xlu2 %1368 }
 0x172   :  { %v556_v30 = vsel %vm549_vm1, %v357_v28, -inf  ;;  %v1371_v31 = vunpack.i.h.bf16 %v1369_v29  ;;  %v1370_v32 = vunpack.i.l.bf16 %v1369_v29 }
 0x173   :  { %557 = vmax.xlane.f32.xlu2 %v556_v30 }
 0x174   :  { %801 = vmatpush.msrb.mxu3 %v1370_v32 }
 0x176   :  { %802 = vmatpush.msrb.mxu3 %v1371_v31 }
 0x178   :  { %v249_v33 = vpop.permute.xlu0 %248  ;;  %1332 = vmatmul.msk.f32.gmra.mxu3 %vm300_vm0, %v231_v21 }
 0x179   :  { %v360_v34 = vpop.f32.mrf.mxu3  ;;  %1322 = vmatpush.xpose.msk.msrb.mxu0 %vm300_vm0, %v249_v33 }
 0x17a   :  { %v559_v35 = vsel %vm549_vm1, %v360_v34, -inf }
 0x17b   :  { %560 = vmax.xlane.f32.xlu0 %v559_v35 }
 0x17c   :  { %1323 = vmatmul.msk.f32.vlgmr.msrb.gmra.mxu0 %vm300_vm0, %v221_v36 }
 0x17d   :  { %714 = vmatpush.msra.mxu0 %v1656_v61 }
 0x17f   :  { %715 = vmatpush.msra.mxu0 %v1652_v60 }
 0x180   :  { %v1364_v37 = vpop.permute.xlu0 %1363 }
 0x181   :  { %v1366_v38 = vunpack.i.h.bf16 %v1364_v37  ;;  %v1365_v39 = vunpack.i.l.bf16 %v1364_v37 }
 0x183   :  { %772 = vmatpush.msrb.mxu2 %v1365_v39 }
 0x184   :  { %1324 = vmatmul.msk.f32.gmra.mxu0 %vm300_vm0, %v223_v25 }
 0x185   :  { %773 = vmatpush.msrb.mxu2 %v1366_v38 }
 0x18f   :  { %1378 = vrot.lane.b32.xlu0 %v1667_v1, %s1573_s7 }
 0x1d3   :  { %v1705_v40 = vpop.f32.mrf.mxu3 }
 0x1d4   :  { %v562_v42 = vsel %vm549_vm1, %v1705_v40, -inf  ;;  %v1709_v46 = vpop.f32.mrf.mxu2 }
 0x1d5   :  { %v552_v43 = vpop.xlane.xlu2 %551  ;;  %563 = vmax.xlane.f32.xlu1 %v562_v42  ;;  %v586_v48 = vsel %vm549_vm1, %v1709_v46, -inf }
 0x1d6   :  { %v598_v44 = vsub.f32 %v326_v19, %v552_v43 }
 0x1d8   :  { %v614_v45 = vmul.f32 1.442695, %v598_v44 }
 0x1da   :  { %1398 = vpow2.f32 %v614_v45 }
 0x1db   :  { %v1711_v47 = vpop.f32.mrf.mxu3 }
 0x1dc   :  { %v565_v4 = vsel %vm549_vm1, %v1711_v47, -inf }
 0x1dd   :  { %v555_v49 = vpop.xlane.xlu1 %554  ;;  %587 = vmax.xlane.f32.xlu1 %v586_v48 }
 0x1de   :  { %v599_v50 = vsub.f32 %v329_v23, %v555_v49 }
 0x1e0   :  { %v1399_v51 = vpop.eup %1398  ;;  %v616_v52 = vmul.f32 1.442695, %v599_v50 }
 0x1e1   :  { %1333 = vmatmul.msk.f32.vlgmr.msra.gmra.mxu0 %vm549_vm1, %v1399_v51  ;;  %v646_v24 = vsel %vm549_vm1, %v1399_v51, 0.0 }
 0x1e2   :  { %1400 = vpow2.f32 %v616_v52 }
 0x1e3   :  { %v1716_v53 = vpop.f32.mrf.mxu3 }
 0x1e4   :  { %v1718_v54 = vpop.f32.mrf.mxu2  ;;  %v568_v10 = vsel %vm549_vm1, %v1716_v53, -inf }
 0x1e5   :  { %v589_v55 = vsel %vm549_vm1, %v1718_v54, -inf }
 0x1e6   :  { %v558_v56 = vpop.xlane.xlu2 %557  ;;  %v1722_v57 = vpop.f32.mrf.mxu0  ;;  %590 = vmax.xlane.f32.xlu0 %v589_v55 }
 0x1e7   :  { %v600_v58 = vsub.f32 %v357_v28, %v558_v56  ;;  %v574_v59 = vsel %vm549_vm1, %v1722_v57, -inf }
 0x1e8   :  { %v1401_v60 = vpop.eup %1400  ;;  %575 = vmax.xlane.f32.xlu2 %v574_v59 }
 0x1e9   :  { %v618_v61 = vmul.f32 1.442695, %v600_v58  ;;  %1334 = vmatmul.msk.f32.gmra.mxu0 %vm549_vm1, %v1401_v60  ;;  %v649_v15 = vsel %vm549_vm1, %v1401_v60, 0.0 }
 0x1eb   :  { %1402 = vpow2.f32 %v618_v61  ;;  %v1727_v62 = vpop.f32.mrf.mxu3 }
 0x1ec   :  { %v571_v11 = vsel %vm549_vm1, %v1727_v62, -inf }
 0x1ee   :  { %v561_v63 = vpop.xlane.xlu0 %560  ;;  %v1729_v1 = vpop.f32.mrf.mxu0 }
 0x1ef   :  { %v601_v2 = vsub.f32 %v360_v34, %v561_v63  ;;  %v577_v3 = vsel %vm549_vm1, %v1729_v1, -inf }
 0x1f0   :  { %578 = vmax.xlane.f32.xlu1 %v577_v3  ;;  %566 = vmax.xlane.f32.xlu2 %v565_v4 }
 0x1f1   :  { %v1403_v5 = vpop.eup %1402  ;;  %v620_v6 = vmul.f32 1.442695, %v601_v2 }
 0x1f2   :  { %1335 = vmatmul.msk.f32.vlgmr.msra.gmra.mxu1 %vm549_vm1, %v1403_v5  ;;  %v652_v28 = vsel %vm549_vm1, %v1403_v5, 0.0 }
 0x1f3   :  { %1404 = vpow2.f32 %v620_v6  ;;  %v1736_v7 = vpop.f32.mrf.mxu3 }
 0x1f4   :  { %v592_v8 = vsel %vm549_vm1, %v1736_v7, -inf }
 0x1f5   :  { %593 = vmax.xlane.f32.xlu0 %v592_v8 }
 0x1f8   :  { %569 = vmax.xlane.f32.xlu2 %v568_v10  ;;  %572 = vmax.xlane.f32.xlu1 %v571_v11 }
 0x1f9   :  { %v1744_v12 = vpop.eup %1404  ;;  %v1746_v14 = vpop.f32.mrf.mxu0 }
 0x1fa   :  { %1336 = vmatmul.msk.f32.vlgmr.msra.gmra.mxu2 %vm549_vm1, %v1744_v12  ;;  %v580_v16 = vsel %vm549_vm1, %v1746_v14, -inf }
 0x1fb   :  { %888 = vmatpush.msra.mxu2 %v1375_v9  ;;  %v1757_v22 = vpop.f32.mrf.mxu3 }
 0x1fc   :  { %v595_v23 = vsel %vm549_vm1, %v1757_v22, -inf }
 0x1fd   :  { %650 = vadd.xlane.f32.xlu0 %v649_v15  ;;  %889 = vmatpush.msra.mxu2 %v1376_v13 }
 0x200   :  { %581 = vmax.xlane.f32.xlu2 %v580_v16 }
 0x201   :  { %v1753_v17 = vpop.f32.mrf.mxu0  ;;  %v1379_v18 = vpop.permute.xlu0 %1378 }
 0x202   :  { %v583_v19 = vsel %vm549_vm1, %v1753_v17, -inf  ;;  %v1381_v20 = vunpack.i.h.bf16 %v1379_v18  ;;  %v1380_v21 = vunpack.i.l.bf16 %v1379_v18 }
 0x203   :  { %584 = vmax.xlane.f32.xlu1 %v583_v19 }
 0x204   :  { %830 = vmatpush.msrb.mxu0 %v1380_v21 }
 0x206   :  { %831 = vmatpush.msrb.mxu0 %v1381_v20 }
 0x20b   :  { %596 = vmax.xlane.f32.xlu1 %v595_v23 }
 0x218   :  { %1383 = vrot.lane.b32.xlu2 %v1661_v0, %s1572_s6 }
 0x224   :  { %1388 = vrot.lane.b32.xlu1 %v1661_v0, %s1573_s7 }
 0x241   :  { %647 = vadd.xlane.f32.xlu2 %v646_v24 }
 0x248   :  { %v564_v25 = vpop.xlane.xlu1 %563 }
 0x249   :  { %v602_v26 = vsub.f32 %v1705_v40, %v564_v25 }
 0x24b   :  { %v622_v27 = vmul.f32 1.442695, %v602_v26 }
 0x24d   :  { %1406 = vpow2.f32 %v622_v27 }
 0x24e   :  { %653 = vadd.xlane.f32.xlu1 %v652_v28 }
 0x250   :  { %v588_v31 = vpop.xlane.xlu1 %587 }
 0x251   :  { %v610_v33 = vsub.f32 %v1709_v46, %v588_v31 }
 0x253   :  { %v1407_v29 = vpop.eup %1406  ;;  %v638_v35 = vmul.f32 1.442695, %v610_v33 }
 0x254   :  { %1337 = vmatmul.msk.f32.vlgmr.msrb.gmra.mxu2 %vm549_vm1, %v1407_v29  ;;  %v658_v30 = vsel %vm549_vm1, %v1407_v29, 0.0 }
 0x255   :  { %659 = vadd.xlane.f32.xlu2 %v658_v30 }
 0x259   :  { %v591_v44 = vpop.xlane.xlu0 %590 }
 0x25b   :  { %v576_v32 = vpop.xlane.xlu2 %575 }
 0x25c   :  { %v606_v0 = vsub.f32 %v1722_v57, %v576_v32 }
 0x25e   :  { %v630_v34 = vmul.f32 1.442695, %v606_v0  ;;  %v1807_v32 = vpop.f32.mrf.mxu0 }
 0x260   :  { %1408 = vpow2.f32 %v630_v34 }
 0x261   :  { %1410 = vpow2.f32 %v638_v35 }
 0x263   :  { %v579_v36 = vpop.xlane.xlu1 %578  ;;  %v567_v37 = vpop.xlane.xlu2 %566 }
 0x264   :  { %v607_v38 = vsub.f32 %v1729_v1, %v579_v36  ;;  %v603_v39 = vsub.f32 %v1711_v47, %v567_v37  ;;  %v611_v47 = vsub.f32 %v1718_v54, %v591_v44 }
 0x266   :  { %v1409_v40 = vpop.eup %1408  ;;  %v632_v41 = vmul.f32 1.442695, %v607_v38  ;;  %v624_v42 = vmul.f32 1.442695, %v603_v39  ;;  %v1813_v39 = vpop.f32.mrf.mxu0 }
 0x267   :  { %1341 = vmatmul.msk.f32.vlgmr.msrb.gmra.mxu0 %vm549_vm1, %v1409_v40  ;;  %v670_v43 = vsel %vm549_vm1, %v1409_v40, 0.0  ;;  %v1411_v46 = vpop.eup %1410 }
 0x268   :  { %1412 = vpow2.f32 %v632_v41  ;;  %671 = vadd.xlane.f32.xlu0 %v670_v43  ;;  %v682_v56 = vsel %vm549_vm1, %v1411_v46, 0.0  ;;  %v594_v60 = vpop.xlane.xlu0 %593 }
 0x269   :  { %1414 = vpow2.f32 %v624_v42  ;;  %v612_v2 = vsub.f32 %v1736_v7, %v594_v60 }
 0x26b   :  { %v570_v45 = vpop.xlane.xlu2 %569  ;;  %v573_v49 = vpop.xlane.xlu1 %572  ;;  %v642_v5 = vmul.f32 1.442695, %v612_v2 }
 0x26c   :  { %v604_v48 = vsub.f32 %v1716_v53, %v570_v45  ;;  %v605_v55 = vsub.f32 %v1727_v62, %v573_v49  ;;  %v640_v53 = vmul.f32 1.442695, %v611_v47 }
 0x26e   :  { %v1413_v50 = vpop.eup %1412  ;;  %v626_v51 = vmul.f32 1.442695, %v604_v48  ;;  %v628_v58 = vmul.f32 1.442695, %v605_v55 }
 0x26f   :  { %v1415_v52 = vpop.eup %1414  ;;  %1342 = vmatmul.msk.f32.gmra.mxu0 %vm549_vm1, %v1413_v50  ;;  %v673_v1 = vsel %vm549_vm1, %v1413_v50, 0.0 }
 0x270   :  { %1416 = vpow2.f32 %v626_v51  ;;  %1338 = vmatmul.msk.f32.gmra.mxu2 %vm549_vm1, %v1415_v52  ;;  %683 = vadd.xlane.f32.xlu0 %v682_v56  ;;  %v661_v57 = vsel %vm549_vm1, %v1415_v52, 0.0  ;;  %v1805_v30 = vpop.xlane.xlu0 %650 }
 0x271   :  { %662 = vadd.xlane.f32.xlu1 %v661_v57  ;;  %1418 = vpow2.f32 %v640_v53 }
 0x272   :  { %1420 = vpow2.f32 %v628_v58 }
 0x273   :  { %v582_v59 = vpop.xlane.xlu2 %581 }
 0x274   :  { %v608_v54 = vsub.f32 %v1746_v14, %v582_v59 }
 0x276   :  { %v1417_v61 = vpop.eup %1416  ;;  %v634_v62 = vmul.f32 1.442695, %v608_v54  ;;  %v585_v63 = vpop.xlane.xlu1 %584 }
 0x277   :  { %1339 = vmatmul.msk.f32.vlgmr.msrb.gmra.mxu3 %vm549_vm1, %v1417_v61  ;;  %v1419_v4 = vpop.eup %1418  ;;  %v609_v11 = vsub.f32 %v1753_v17, %v585_v63  ;;  %v664_v20 = vsel %vm549_vm1, %v1417_v61, 0.0 }
 0x278   :  { %1422 = vpow2.f32 %v634_v62  ;;  %1345 = vmatmul.msk.f32.vlgmr.msra.gmra.mxu2 %vm549_vm1, %v1411_v46  ;;  %674 = vadd.xlane.f32.xlu0 %v673_v1  ;;  %v1421_v8 = vpop.eup %1420  ;;  %v685_v15 = vsel %vm549_vm1, %v1419_v4, 0.0 }
 0x279   :  { %1424 = vpow2.f32 %v642_v5  ;;  %v636_v18 = vmul.f32 1.442695, %v609_v11  ;;  %v667_v17 = vsel %vm549_vm1, %v1421_v8, 0.0 }
 0x27b   :  { %v1384_v3 = vpop.permute.xlu2 %1383 }
 0x27c   :  { %v1385_v6 = vunpack.i.l.bf16 %v1384_v3  ;;  %v1386_v13 = vunpack.i.h.bf16 %v1384_v3 }
 0x27d   :  { %v1815_v42 = vpop.f32.mrf.mxu2 }
 0x27e   :  { %v1423_v9 = vpop.eup %1422  ;;  %917 = vmatpush.msra.mxu3 %v1385_v6  ;;  %v597_v10 = vpop.xlane.xlu1 %596 }
 0x27f   :  { %v613_v14 = vsub.f32 %v1757_v22, %v597_v10  ;;  %1340 = vmatmul.msk.f32.gmra.mxu3 %vm549_vm1, %v1421_v8  ;;  %v676_v7 = vsel %vm549_vm1, %v1423_v9, 0.0  ;;  %v1425_v19 = vpop.eup %1424 }
 0x280   :  { %1346 = vmatmul.msk.f32.gmra.mxu2 %vm549_vm1, %v1419_v4  ;;  %677 = vadd.xlane.f32.xlu2 %v676_v7  ;;  %v688_v27 = vsel %vm549_vm1, %v1425_v19, 0.0 }
 0x281   :  { %v644_v16 = vmul.f32 1.442695, %v613_v14  ;;  %918 = vmatpush.msra.mxu3 %v1386_v13  ;;  %686 = vadd.xlane.f32.xlu0 %v685_v15 }
 0x283   :  { %1426 = vpow2.f32 %v644_v16 }
 0x284   :  { %1428 = vpow2.f32 %v636_v18 }
 0x287   :  { %1347 = vmatmul.msk.f32.vlgmr.msra.gmra.mxu3 %vm549_vm1, %v1425_v19 }
 0x288   :  { %668 = vadd.xlane.f32.xlu2 %v667_v17 }
 0x289   :  { %v1427_v21 = vpop.eup %1426  ;;  %665 = vadd.xlane.f32.xlu0 %v664_v20 }
 0x28a   :  { %v691_v22 = vsel %vm549_vm1, %v1427_v21, 0.0  ;;  %v1429_v23 = vpop.eup %1428 }
 0x28b   :  { %692 = vadd.xlane.f32.xlu1 %v691_v22  ;;  %v679_v24 = vsel %vm549_vm1, %v1429_v23, 0.0 }
 0x28f   :  { %1348 = vmatmul.msk.f32.gmra.mxu3 %vm549_vm1, %v1427_v21 }
 0x291   :  { %680 = vadd.xlane.f32.xlu0 %v679_v24 }
 0x296   :  { %v1389_v25 = vpop.permute.xlu1 %1388 }
 0x297   :  { %v1390_v26 = vunpack.i.l.bf16 %v1389_v25  ;;  %v1391_v28 = vunpack.i.h.bf16 %v1389_v25 }
 0x299   :  { %689 = vadd.xlane.f32.xlu0 %v688_v27  ;;  %859 = vmatpush.msrb.mxu1 %v1390_v26 }
 0x29b   :  { %860 = vmatpush.msrb.mxu1 %v1391_v28 }
 0x29c   :  { %1343 = vmatmul.msk.f32.vlgmr.msrb.gmra.mxu1 %vm549_vm1, %v1423_v9 }
 0x2a4   :  { %1344 = vmatmul.msk.f32.gmra.mxu1 %vm549_vm1, %v1429_v23 }
 0x2b4   :  { %v1803_v29 = vpop.xlane.xlu2 %647 }
 0x2c1   :  { %v1809_v33 = vpop.xlane.xlu1 %653 }
 0x2c8   :  { %v660_v31 = vpop.xlane.xlu2 %659 }
 0x2c9   :  { %1430 = vrcp.f32 %v660_v31  ;;  %v993_v59 = vand.u32 2147483648, %v660_v31  ;;  %vm987_vm7 = vweird.f32 %v660_v31  ;;  %v991_v60 = vand.u32 2147483647, %v660_v31 }
 0x2cb   :  { %v994_v3 = vor.u32 1.1754944e-38, %v993_v59  ;;  %vm992_vm10 = vcmp.eq.f32.partialorder %v991_v60, 8.507059e+37  ;;  %v1846_v59 = vpop.f32.mrf.mxu1 }
 0x2cf   :  { %v1431_v34 = vpop.eup %1430 }
 0x2d0   :  { %v983_v35 = vmul.f32 %v1431_v34, %v660_v31  ;;  %vm988_vm5 = vweird.f32 %v1431_v34 }
 0x2d1   :  { %vm989_vm8 = vmor %vm987_vm7, %vm988_vm5 }
 0x2d2   :  { %v984_v40 = vsub.f32 1.0, %v983_v35 }
 0x2d4   :  { %v985_v48 = vmul.f32 %v1431_v34, %v984_v40 }
 0x2d6   :  { %v986_v55 = vadd.f32 %v1431_v34, %v985_v48 }
 0x2d7   :  { %v775_v58 = vpop.f32.mrf.mxu2 }
 0x2d8   :  { %v990_v63 = vsel %vm989_vm8, %v1431_v34, %v986_v55 }
 0x2d9   :  { %v995_v6 = vsel %vm992_vm10, %v994_v3, %v990_v63 }
 0x2da   :  { %v1154_v15 = vmul.f32 %v995_v6, %v775_v58 }
 0x2db   :  { %v672_v0 = vpop.xlane.xlu0 %671 }
 0x2dc   :  { %1432 = vrcp.f32 %v672_v0  ;;  %v1049_v44 = vand.u32 2147483648, %v672_v0  ;;  %v1047_v46 = vand.u32 2147483647, %v672_v0  ;;  %vm1043_vm3 = vweird.f32 %v672_v0 }
 0x2de   :  { %v1050_v50 = vor.u32 1.1754944e-38, %v1049_v44  ;;  %vm1048_vm6 = vcmp.eq.f32.partialorder %v1047_v46, 8.507059e+37 }
 0x2e2   :  { %v1433_v36 = vpop.eup %1432 }
 0x2e3   :  { %v1039_v37 = vmul.f32 %v1433_v36, %v672_v0  ;;  %v1811_v38 = vpop.xlane.xlu0 %683  ;;  %vm1044_vm2 = vweird.f32 %v1433_v36 }
 0x2e4   :  { %v663_v41 = vpop.xlane.xlu1 %662  ;;  %vm1045_vm4 = vmor %vm1043_vm3, %vm1044_vm2  ;;  %v833_v57 = vpop.f32.mrf.mxu0 }
 0x2e5   :  { %v1040_v43 = vsub.f32 1.0, %v1039_v37  ;;  %1434 = vrcp.f32 %v663_v41  ;;  %v1007_v62 = vand.u32 2147483648, %v663_v41  ;;  %v1005_v2 = vand.u32 2147483647, %v663_v41 }
 0x2e6   :  { %vm1001_vm11 = vweird.f32 %v663_v41 }
 0x2e7   :  { %v1041_v45 = vmul.f32 %v1433_v36, %v1040_v43  ;;  %v1008_v9 = vor.u32 1.1754944e-38, %v1007_v62  ;;  %vm1006_vm13 = vcmp.eq.f32.partialorder %v1005_v2, 8.507059e+37 }
 0x2e9   :  { %v1042_v49 = vadd.f32 %v1433_v36, %v1041_v45 }
 0x2eb   :  { %v1435_v47 = vpop.eup %1434  ;;  %v1046_v51 = vsel %vm1045_vm4, %v1433_v36, %v1042_v49  ;;  %v675_v52 = vpop.xlane.xlu0 %674 }
 0x2ec   :  { %v997_v56 = vmul.f32 %v1435_v47, %v663_v41  ;;  %v1051_v53 = vsel %vm1048_vm6, %v1050_v50, %v1046_v51  ;;  %1436 = vrcp.f32 %v675_v52  ;;  %vm1002_vm9 = vweird.f32 %v1435_v47  ;;  %v836_v27 = vpop.f32.mrf.mxu0 }
 0x2ed   :  { %v1158_v54 = vmul.f32 %v1051_v53, %v833_v57  ;;  %vm1003_vm12 = vmor %vm1001_vm11, %vm1002_vm9  ;;  %v1063_v19 = vand.u32 2147483648, %v675_v52  ;;  %v1061_v17 = vand.u32 2147483647, %v675_v52  ;;  %vm1057_vm15 = vweird.f32 %v675_v52 }
 0x2ee   :  { %v998_v61 = vsub.f32 1.0, %v997_v56 }
 0x2ef   :  { %1176 = vrot.lane.b32.xlu0 %v1158_v54, %s1573_s7  ;;  %v1064_v24 = vor.u32 1.1754944e-38, %v1063_v19  ;;  %vm1062_vm3 = vcmp.eq.f32.partialorder %v1061_v17, 8.507059e+37 }
 0x2f0   :  { %v999_v1 = vmul.f32 %v1435_v47, %v998_v61 }
 0x2f2   :  { %v1437_v4 = vpop.eup %1436  ;;  %v1000_v5 = vadd.f32 %v1435_v47, %v999_v1 }
 0x2f3   :  { %v1053_v8 = vmul.f32 %v1437_v4, %v675_v52  ;;  %v778_v14 = vpop.f32.mrf.mxu2  ;;  %vm1058_vm14 = vweird.f32 %v1437_v4  ;;  %v1821_v22 = vpop.xlane.xlu2 %677 }
 0x2f4   :  { %v1004_v10 = vsel %vm1003_vm12, %v1435_v47, %v1000_v5  ;;  %v1819_v11 = vpop.xlane.xlu0 %686  ;;  %vm1059_vm2 = vmor %vm1057_vm15, %vm1058_vm14  ;;  %1438 = vrcp.f32 %v1821_v22  ;;  %v1075_v1 = vand.u32 2147483647, %v1821_v22  ;;  %v1077_v2 = vand.u32 2147483648, %v1821_v22 }
 0x2f5   :  { %v1054_v13 = vsub.f32 1.0, %v1053_v8  ;;  %v1009_v7 = vsel %vm1006_vm13, %v1008_v9, %v1004_v10  ;;  %vm1071_vm9 = vweird.f32 %v1821_v22 }
 0x2f6   :  { %v1155_v16 = vmul.f32 %v1009_v7, %v778_v14  ;;  %v655_v14 = vsel %vm549_vm1, %v1744_v12, 0.0  ;;  %vm1076_vm11 = vcmp.eq.f32.partialorder %v1075_v1, 8.507059e+37  ;;  %v1078_v7 = vor.u32 1.1754944e-38, %v1077_v2 }
 0x2f7   :  { %v1055_v18 = vmul.f32 %v1437_v4, %v1054_v13  ;;  %vm1099_vm1 = vweird.f32 %v1811_v38 }
 0x2f8   :  { %v1392_v20 = vpack.i.bf16 %v1155_v16, %v1154_v15 }
 0x2f9   :  { %v1056_v21 = vadd.f32 %v1437_v4, %v1055_v18 }
 0x2fa   :  { %1393 = vrot.lane.b32.xlu2 %v1392_v20, %s1572_s6  ;;  %v1825_v31 = vpop.eup %1438  ;;  %v804_v43 = vpop.f32.mrf.mxu3 }
 0x2fb   :  { %v1060_v23 = vsel %vm1059_vm2, %v1437_v4, %v1056_v21  ;;  %v1067_v36 = vmul.f32 %v1825_v31, %v1821_v22  ;;  %v1842_v53 = vpop.xlane.xlu2 %668  ;;  %vm1072_vm8 = vweird.f32 %v1825_v31 }
 0x2fc   :  { %v666_v25 = vpop.xlane.xlu0 %665  ;;  %v1065_v26 = vsel %vm1062_vm3, %v1064_v24, %v1060_v23  ;;  %vm1862_vm10 = vmor %vm1071_vm9, %vm1072_vm8  ;;  %vm1113_vm9 = vweird.f32 %v1819_v11  ;;  %v1033_v6 = vand.u32 2147483647, %v1842_v53 }
 0x2fd   :  { %1440 = vrcp.f32 %v666_v25  ;;  %v1159_v28 = vmul.f32 %v1065_v26, %v836_v27  ;;  %v1021_v41 = vand.u32 2147483648, %v666_v25  ;;  %v1019_v44 = vand.u32 2147483647, %v666_v25 }
 0x2fe   :  { %1442 = vrcp.f32 %v1811_v38  ;;  %v1068_v46 = vsub.f32 1.0, %v1067_v36  ;;  %vm1015_vm5 = vweird.f32 %v666_v25  ;;  %v1875_v22 = vpop.xlane.xlu1 %692  ;;  %v1105_v26 = vand.u32 2147483648, %v1811_v38 }
 0x2ff   :  { %v1022_v49 = vor.u32 1.1754944e-38, %v1021_v41  ;;  %vm1020_vm7 = vcmp.eq.f32.partialorder %v1019_v44, 8.507059e+37 }
 0x300   :  { %v1069_v55 = vmul.f32 %v1825_v31, %v1068_v46  ;;  %v1106_v44 = vor.u32 1.1754944e-38, %v1105_v26  ;;  %v1237_v26 = vld [vmem:[#allocation7 + $0x48] sm:$0xff] }
 0x302   :  { %1178 = vrot.lane.b32.xlu2 %v1159_v28, %s1573_s7  ;;  %v1070_v61 = vadd.f32 %v1825_v31, %v1069_v55  ;;  %v1854_v63 = vpop.f32.mrf.mxu3 }
 0x303   :  { %v1441_v0 = vpop.eup %1440 }
 0x304   :  { %v1011_v34 = vmul.f32 %v1441_v0, %v666_v25  ;;  %v1829_v35 = vpop.xlane.xlu0 %680  ;;  %vm1016_vm4 = vweird.f32 %v1441_v0  ;;  %v1834_v45 = vpop.eup %1442  ;;  %v1074_v10 = vsel %vm1862_vm10, %v1825_v31, %v1070_v61  ;;  %v1103_v25 = vand.u32 2147483647, %v1811_v38 }
 0x305   :  { %1444 = vrcp.f32 %v1829_v35  ;;  %vm1017_vm6 = vmor %vm1015_vm5, %vm1016_vm4  ;;  %v1095_v51 = vmul.f32 %v1834_v45, %v1811_v38  ;;  %vm1100_vm13 = vweird.f32 %v1834_v45  ;;  %v1079_v21 = vsel %vm1076_vm11, %v1078_v7, %v1074_v10 }
 0x306   :  { %v1012_v37 = vsub.f32 1.0, %v1011_v34  ;;  %1446 = vrcp.f32 %v1819_v11  ;;  %vm1888_vm3 = vmor %vm1099_vm1, %vm1100_vm13  ;;  %vm1104_vm5 = vcmp.eq.f32.partialorder %v1103_v25, 8.507059e+37  ;;  %v1091_v46 = vand.u32 2147483648, %v1829_v35  ;;  %v1239_v25 = vld [vmem:[#allocation7 + $0x58] sm:$0xff]  ;;  %v1232_v34 = vld [vmem:[#allocation7 + $0x20] sm:$0xff] }
 0x307   :  { %v1096_v54 = vsub.f32 1.0, %v1095_v51 }
 0x308   :  { %v1013_v40 = vmul.f32 %v1441_v0, %v1012_v37 }
 0x309   :  { %v1097_v5 = vmul.f32 %v1834_v45, %v1096_v54 }
 0x30a   :  { %v1014_v48 = vadd.f32 %v1441_v0, %v1013_v40  ;;  %v920_v38 = vpop.f32.mrf.mxu3 }
 0x30b   :  { %v1840_v56 = vpop.eup %1444  ;;  %v1098_v17 = vadd.f32 %v1834_v45, %v1097_v5 }
 0x30c   :  { %v690_v50 = vpop.xlane.xlu0 %689  ;;  %v1018_v47 = vsel %vm1017_vm6, %v1441_v0, %v1014_v48  ;;  %v1844_v58 = vpop.eup %1446  ;;  %v1081_v60 = vmul.f32 %v1840_v56, %v1829_v35  ;;  %vm1086_vm4 = vweird.f32 %v1840_v56 }
 0x30d   :  { %1448 = vrcp.f32 %v690_v50  ;;  %v1023_v52 = vsel %vm1020_vm7, %v1022_v49, %v1018_v47  ;;  %v1109_v3 = vmul.f32 %v1844_v58, %v1819_v11  ;;  %v1133_v13 = vand.u32 2147483648, %v690_v50 }
 0x30e   :  { %v1156_v57 = vmul.f32 %v1023_v52, %v804_v43  ;;  %1450 = vrcp.f32 %v1842_v53  ;;  %v1082_v8 = vsub.f32 1.0, %v1081_v60  ;;  %v1131_v18 = vand.u32 2147483647, %v690_v50  ;;  %v891_v43 = vpop.f32.mrf.mxu2 }
 0x30f   :  { %v1110_v15 = vsub.f32 1.0, %v1109_v3  ;;  %vm1127_vm14 = vweird.f32 %v690_v50  ;;  %v1134_v27 = vor.u32 1.1754944e-38, %v1133_v13  ;;  %1452 = vrcp.f32 %v1875_v22 }
 0x310   :  { %1200 = vrot.lane.b32.xlu2 %v1156_v57, %s1572_s6  ;;  %v1083_v24 = vmul.f32 %v1840_v56, %v1082_v8  ;;  %vm1132_vm2 = vcmp.eq.f32.partialorder %v1131_v18, 8.507059e+37  ;;  %v1102_v37 = vsel %vm1888_vm3, %v1834_v45, %v1098_v17  ;;  %vm1114_vm6 = vweird.f32 %v1844_v58 }
 0x311   :  { %v1111_v31 = vmul.f32 %v1844_v58, %v1110_v15  ;;  %vm1085_vm7 = vweird.f32 %v1829_v35  ;;  %v1089_v45 = vand.u32 2147483647, %v1829_v35  ;;  %v1119_v47 = vand.u32 2147483648, %v1819_v11  ;;  %vm1115_vm10 = vmor %vm1113_vm9, %vm1114_vm6 }
 0x312   :  { %v1084_v41 = vadd.f32 %v1840_v56, %v1083_v24  ;;  %vm1087_vm8 = vmor %vm1085_vm7, %vm1086_vm4  ;;  %v1117_v52 = vand.u32 2147483647, %v1819_v11  ;;  %v1092_v60 = vor.u32 1.1754944e-38, %v1091_v46  ;;  %vm1141_vm3 = vweird.f32 %v1875_v22  ;;  %v1240_v24 = vld [vmem:[#allocation7 + $0x60] sm:$0xff] }
 0x313   :  { %v1449_v62 = vpop.eup %1448  ;;  %v1112_v49 = vadd.f32 %v1844_v58, %v1111_v31  ;;  %vm1090_vm11 = vcmp.eq.f32.partialorder %v1089_v45, 8.507059e+37  ;;  %v1234_v31 = vld [vmem:[#allocation7 + $0x30] sm:$0xff]  ;;  %1454 = vrcp.f32 %v1803_v29  ;;  %vm931_vm7 = vweird.f32 %v1803_v29 }
 0x314   :  { %v1123_v4 = vmul.f32 %v1449_v62, %v690_v50  ;;  %vm1128_vm12 = vweird.f32 %v1449_v62  ;;  %v1871_v19 = vpop.eup %1450  ;;  %v1107_v50 = vsel %vm1104_vm5, %v1106_v44, %v1102_v37  ;;  %v1088_v55 = vsel %vm1087_vm8, %v1840_v56, %v1084_v41  ;;  %v1229_v37 = vld [vmem:[#allocation7 + $0x8] sm:$0xff]  ;;  %v1228_v41 = vld [vmem:[#allocation7] sm:$0xff] }
 0x315   :  { %vm1129_vm15 = vmor %vm1127_vm14, %vm1128_vm12  ;;  %v1025_v28 = vmul.f32 %v1871_v19, %v1842_v53  ;;  %v1162_v51 = vmul.f32 %v1107_v50, %v891_v43  ;;  %v1453_v57 = vpop.eup %1452  ;;  %v1116_v35 = vsel %vm1115_vm10, %v1844_v58, %v1112_v49  ;;  %v1093_v1 = vsel %vm1090_vm11, %v1092_v60, %v1088_v55 }
 0x316   :  { %v1124_v9 = vsub.f32 1.0, %v1123_v4  ;;  %v1137_v2 = vmul.f32 %v1453_v57, %v1875_v22  ;;  %vm1118_vm12 = vcmp.eq.f32.partialorder %v1117_v52, 8.507059e+37  ;;  %vm1030_vm13 = vweird.f32 %v1871_v19  ;;  %v894_v5 = vpop.f32.mrf.mxu2 }
 0x317   :  { %v1026_v48 = vsub.f32 1.0, %v1025_v28  ;;  %v1035_v4 = vand.u32 2147483648, %v1842_v53  ;;  %vm1029_vm14 = vweird.f32 %v1842_v53  ;;  %v1145_v53 = vand.u32 2147483647, %v1875_v22  ;;  %v1235_v28 = vld [vmem:[#allocation7 + $0x38] sm:$0xff] }
 0x318   :  { %v1125_v16 = vmul.f32 %v1449_v62, %v1124_v9  ;;  %v1138_v58 = vsub.f32 1.0, %v1137_v2  ;;  %vm1031_vm1 = vmor %vm1029_vm14, %vm1030_vm13  ;;  %1456 = vrcp.f32 %v1805_v30  ;;  %v937_v55 = vand.u32 2147483648, %v1803_v29 }
 0x319   :  { %656 = vadd.xlane.f32.xlu0 %v655_v14  ;;  %v862_v20 = vpop.f32.mrf.mxu1  ;;  %v1027_v61 = vmul.f32 %v1871_v19, %v1026_v48  ;;  %v1036_v10 = vor.u32 1.1754944e-38, %v1035_v4  ;;  %vm1146_vm5 = vcmp.eq.f32.partialorder %v1145_v53, 8.507059e+37  ;;  %1458 = vrcp.f32 %v1809_v33 }
 0x31a   :  { %v1160_v23 = vmul.f32 %v1079_v21, %v862_v20  ;;  %v1126_v12 = vadd.f32 %v1449_v62, %v1125_v16  ;;  %v1139_v13 = vmul.f32 %v1453_v57, %v1138_v58  ;;  %v1147_v16 = vand.u32 2147483648, %v1875_v22  ;;  %v1238_v22 = vld [vmem:[#allocation7 + $0x50] sm:$0xff] }
 0x31b   :  { %v1028_v3 = vadd.f32 %v1871_v19, %v1027_v61  ;;  %v949_v4 = vand.u32 2147483647, %v1805_v30  ;;  %vm945_vm11 = vweird.f32 %v1805_v30  ;;  %vm1192_vm13 = vcmask 523264  }
 0x31c   :  { %1208 = vrot.lane.b32.xlu1 %v1160_v23, %s1573_s7  ;;  %v1130_v0 = vsel %vm1129_vm15, %v1449_v62, %v1126_v12  ;;  %v1120_v62 = vor.u32 1.1754944e-38, %v1119_v47  ;;  %vm1034_vm15 = vcmp.eq.f32.partialorder %v1033_v6, 8.507059e+37  ;;  %v1140_v15 = vadd.f32 %v1453_v57, %v1139_v13  ;;  %v1242_v23 = vld [vmem:[#allocation7 + $0x70] sm:$0xff]  ;;  %v1241_v12 = vld [vmem:[#allocation7 + $0x68] sm:$0xff] }
 0x31d   :  { %v1135_v36 = vsel %vm1132_vm2, %v1134_v27, %v1130_v0  ;;  %v1032_v9 = vsel %vm1031_vm1, %v1871_v19, %v1028_v3  ;;  %vm1142_vm2 = vweird.f32 %v1453_v57  ;;  %v923_v19 = vpop.f32.mrf.mxu3  ;;  %v1148_v17 = vor.u32 1.1754944e-38, %v1147_v16  ;;  %v1236_v27 = vld [vmem:[#allocation7 + $0x40] sm:$0xff]  ;;  %v1233_v0 = vld [vmem:[#allocation7 + $0x28] sm:$0xff] }
 0x31e   :  { %v1164_v40 = vmul.f32 %v1135_v36, %v920_v38  ;;  %v1121_v56 = vsel %vm1118_vm12, %v1120_v62, %v1116_v35  ;;  %v1037_v14 = vsel %vm1034_vm15, %v1036_v10, %v1032_v9  ;;  %vm1143_vm4 = vmor %vm1141_vm3, %vm1142_vm2  ;;  %v1231_v38 = vld [vmem:[#allocation7 + $0x18] sm:$0xff]  ;;  %v1230_v36 = vld [vmem:[#allocation7 + $0x10] sm:$0xff]  ;;  %v938_v62 = vor.u32 1.1754944e-38, %v937_v55 }
 0x31f   :  { %v1163_v8 = vmul.f32 %v1121_v56, %v894_v5  ;;  %v1157_v7 = vmul.f32 %v1037_v14, %v1854_v63  ;;  %v1144_v18 = vsel %vm1143_vm4, %v1453_v57, %v1140_v15  ;;  %v1243_v63 = vld [vmem:[#allocation7 + $0x78] sm:$0xff]  ;;  %v935_v57 = vand.u32 2147483647, %v1803_v29 }
 0x320   :  { %1216 = vrot.lane.b32.xlu2 %v1164_v40, %s1571_s2  ;;  %v1149_v20 = vsel %vm1146_vm5, %v1148_v17, %v1144_v18  ;;  %1248 = vmatpush.msra.mxu0 %v1243_v63  ;;  %v1455_v40 = vpop.eup %1454  ;;  %vm950_vm14 = vcmp.eq.f32.partialorder %v949_v4, 8.507059e+37  ;;  %vm1195_vm1 = vcmask 785408   ;;  %v965_v18 = vand.u32 2147483648, %v1809_v33 }
 0x321   :  { %v865_v54 = vpop.f32.mrf.mxu1  ;;  %v1165_v21 = vmul.f32 %v1149_v20, %v923_v19  ;;  %v927_v43 = vmul.f32 %v1455_v40, %v1803_v29  ;;  %v1457_v46 = vpop.eup %1456  ;;  %vm932_vm6 = vweird.f32 %v1455_v40  ;;  %vm936_vm9 = vcmp.eq.f32.partialorder %v935_v57, 8.507059e+37 }
 0x322   :  { %v1161_v11 = vmul.f32 %v1093_v1, %v865_v54  ;;  %1249 = vmatpush.msra.mxu0 %v1242_v23  ;;  %v941_v49 = vmul.f32 %v1457_v46, %v1805_v30  ;;  %v1459_v50 = vpop.eup %1458  ;;  %vm933_vm8 = vmor %vm931_vm7, %vm932_vm6  ;;  %vm946_vm10 = vweird.f32 %v1457_v46  ;;  %v951_v29 = vand.u32 2147483648, %v1805_v30 }
 0x323   :  { %v928_v44 = vsub.f32 1.0, %v927_v43  ;;  %v955_v54 = vmul.f32 %v1459_v50, %v1809_v33  ;;  %vm1944_vm12 = vmor %vm945_vm11, %vm946_vm10  ;;  %vm960_vm15 = vweird.f32 %v1459_v50  ;;  %vm959_vm2 = vweird.f32 %v1809_v33 }
 0x324   :  { %1184 = vrot.lane.b32.xlu1 %v1162_v51, %s1571_s2  ;;  %1250 = vmatpush.msra.mxu0 %v1241_v12  ;;  %v942_v47 = vsub.f32 1.0, %v941_v49  ;;  %v963_v17 = vand.u32 2147483647, %v1809_v33  ;;  %vm961_vm3 = vmor %vm959_vm2, %vm960_vm15 }
 0x325   :  { %v929_v45 = vmul.f32 %v1455_v40, %v928_v44  ;;  %v956_v2 = vsub.f32 1.0, %v955_v54 }
 0x326   :  { %1251 = vmatpush.msra.mxu0 %v1240_v24  ;;  %v943_v61 = vmul.f32 %v1457_v46, %v942_v47  ;;  %v966_v24 = vor.u32 1.1754944e-38, %v965_v18  ;;  %vm964_vm4 = vcmp.eq.f32.partialorder %v963_v17, 8.507059e+37  ;;  %v1397_v47 = vld [vmem:[%s1984_s3] ss:$0 sm:$0xff] }
 0x327   :  { %v930_v51 = vadd.f32 %v1455_v40, %v929_v45  ;;  %v957_v58 = vmul.f32 %v1459_v50, %v956_v2 }
 0x328   :  { %1210 = vrot.lane.b32.xlu2 %v1161_v11, %s1573_s7  ;;  %1252 = vmatpush.msra.mxu0 %v1239_v25  ;;  %v944_v56 = vadd.f32 %v1457_v46, %v943_v61 }
 0x329   :  { %v934_v35 = vsel %vm933_vm8, %v1455_v40, %v930_v51  ;;  %v958_v16 = vadd.f32 %v1459_v50, %v957_v58 }
 0x32a   :  { %1253 = vmatpush.msra.mxu0 %v1238_v22  ;;  %v939_v11 = vsel %vm936_vm9, %v938_v62, %v934_v35  ;;  %v948_v13 = vsel %vm1944_vm12, %v1457_v46, %v944_v56 }
 0x32b   :  { %v962_v63 = vsel %vm961_vm3, %v1459_v50, %v958_v16 }
 0x32c   :  { %1186 = vrot.lane.b32.xlu1 %v1163_v8, %s1571_s2  ;;  %1254 = vmatpush.msra.mxu0 %v1237_v26  ;;  %v1150_v8 = vmul.f32 %v939_v11, %v1807_v32  ;;  %v967_v26 = vsel %vm964_vm4, %v966_v24, %v962_v63 }
 0x32e   :  { %1255 = vmatpush.msra.mxu0 %v1236_v27 }
 0x330   :  { %1256 = vmatpush.msra.mxu0 %v1235_v28 }
 0x332   :  { %1257 = vmatpush.msra.mxu0 %v1234_v31 }
 0x334   :  { %1202 = vrot.lane.b32.xlu1 %v1157_v7, %s1572_s6  ;;  %1258 = vmatpush.msra.mxu0 %v1233_v0  ;;  %v952_v7 = vor.u32 1.1754944e-38, %v951_v29 }
 0x336   :  { %1259 = vmatpush.msra.mxu0 %v1232_v34  ;;  %v953_v19 = vsel %vm950_vm14, %v952_v7, %v948_v13 }
 0x338   :  { %1260 = vmatpush.msra.mxu0 %v1231_v38 }
 0x33a   :  { %1261 = vmatpush.msra.mxu0 %v1230_v36 }
 0x33c   :  { %1218 = vrot.lane.b32.xlu1 %v1165_v21, %s1571_s2  ;;  %1262 = vmatpush.msra.mxu0 %v1229_v37  ;;  %v1151_v21 = vmul.f32 %v953_v19, %v1813_v39  ;;  %v1152_v39 = vmul.f32 %v967_v26, %v1846_v59 }
 0x33e   :  { %1263 = vmatpush.msra.mxu0 %v1228_v41 }
 0x354   :  { %v1394_v52 = vpop.permute.xlu2 %1393 }
 0x355   :  { %v1395_v3 = vunpack.i.l.bf16 %v1394_v52  ;;  %v1396_v20 = vunpack.i.h.bf16 %v1394_v52 }
 0x357   :  { %v1190_v14 = vsel %vm300_vm0, %v1150_v8, %v1395_v3  ;;  %v1191_v25 = vsel %vm300_vm0, %v1151_v21, %v1396_v20 }
 0x35c   :  { %v1179_v6 = vpop.permute.xlu2 %1178 }
 0x35d   :  { %v1194_v22 = vsel %vm1192_vm13, %v1191_v25, %v1179_v6 }
 0x361   :  { %v1177_v48 = vpop.permute.xlu0 %1176 }
 0x362   :  { %v1193_v30 = vsel %vm1192_vm13, %v1190_v14, %v1177_v48 }
 0x36a   :  { %v1201_v23 = vpop.permute.xlu2 %1200 }
 0x36b   :  { %v1222_v34 = vsel %vm300_vm0, %v1152_v39, %v1201_v23 }
 0x37a   :  { %v1217_v38 = vpop.permute.xlu2 %1216 }
 0x382   :  { %v1211_v48 = vpop.permute.xlu2 %1210 }
 0x38c   :  { %v1937_v60 = vpop.xlane.xlu0 %656 }
 0x38d   :  { %1460 = vrcp.f32 %v1937_v60  ;;  %v979_v33 = vand.u32 2147483648, %v1937_v60  ;;  %vm973_vm6 = vweird.f32 %v1937_v60  ;;  %v977_v0 = vand.u32 2147483647, %v1937_v60 }
 0x38e   :  { %v1209_v1 = vpop.permute.xlu1 %1208 }
 0x38f   :  { %v980_v37 = vor.u32 1.1754944e-38, %v979_v33  ;;  %v1224_v40 = vsel %vm1192_vm13, %v1222_v34, %v1209_v1  ;;  %vm978_vm8 = vcmp.eq.f32.partialorder %v977_v0, 8.507059e+37 }
 0x390   :  { %v1226_v44 = vsel %vm1195_vm1, %v1224_v40, %v1217_v38 }
 0x393   :  { %v1461_v5 = vpop.eup %1460 }
 0x394   :  { %v969_v10 = vmul.f32 %v1461_v5, %v1937_v60  ;;  %vm974_vm5 = vweird.f32 %v1461_v5 }
 0x395   :  { %vm975_vm7 = vmor %vm973_vm6, %vm974_vm5 }
 0x396   :  { %v1185_v15 = vpop.permute.xlu1 %1184  ;;  %v970_v32 = vsub.f32 1.0, %v969_v10 }
 0x397   :  { %v1196_v53 = vsel %vm1195_vm1, %v1193_v30, %v1185_v15 }
 0x398   :  { %1264 = vmatmul.f32.vlgmr.msra.gmra.mxu0 %v1196_v53  ;;  %v971_v12 = vmul.f32 %v1461_v5, %v970_v32 }
 0x39a   :  { %v972_v28 = vadd.f32 %v1461_v5, %v971_v12 }
 0x39c   :  { %v976_v36 = vsel %vm975_vm7, %v1461_v5, %v972_v28 }
 0x39d   :  { %v981_v41 = vsel %vm978_vm8, %v980_v37, %v976_v36 }
 0x39e   :  { %v1187_v27 = vpop.permute.xlu1 %1186  ;;  %v1153_v59 = vmul.f32 %v981_v41, %v1815_v42 }
 0x39f   :  { %v1197_v31 = vsel %vm1195_vm1, %v1194_v22, %v1187_v27 }
 0x3a0   :  { %1267 = vmatmul.f32.gmra.mxu0 %v1197_v31 }
 0x3a6   :  { %v1203_v43 = vpop.permute.xlu1 %1202 }
 0x3a7   :  { %v1223_v46 = vsel %vm300_vm0, %v1153_v59, %v1203_v43 }
 0x3a8   :  { %1270 = vmatmul.f32.gmra.mxu0 %v1226_v44  ;;  %v1225_v45 = vsel %vm1192_vm13, %v1223_v46, %v1211_v48 }
 0x3ae   :  { %v1219_v49 = vpop.permute.xlu1 %1218 }
 0x3af   :  { %v1227_v50 = vsel %vm1195_vm1, %v1225_v45, %v1219_v49 }
 0x3b0   :  { %1273 = vmatmul.f32.gmra.mxu0 %v1227_v50 }
 0x415   :  { %v1265_v51 = vpop.f32.mrf.mxu0 }
 0x416   :  { %v1266_v52 = vadd.f32 %v1397_v47, %v1265_v51 }
 0x418   :  { %1277 = vst [vmem:[#allocation8] sm:$0xff] %v1266_v52 }
 0x41d   :  { %v1268_v55 = vpop.f32.mrf.mxu0 }
 0x41e   :  { %v1269_v57 = vadd.f32 %v1397_v47, %v1268_v55 }
 0x420   :  { %1278 = vst [vmem:[#allocation8 + $0x8] sm:$0xff] %v1269_v57 }
 0x425   :  { %v1271_v42 = vpop.f32.mrf.mxu0 }
 0x426   :  { %v1272_v54 = vadd.f32 %v1397_v47, %v1271_v42 }
 0x428   :  { %1279 = vst [vmem:[#allocation8 + $0x10] sm:$0xff] %v1272_v54 }
 0x42d   :  { %v1274_v60 = vpop.f32.mrf.mxu0 }
 0x42e   :  { %v1275_v61 = vadd.f32 %v1397_v47, %v1274_v60 }
 0x430   :  { %1280 = vst [vmem:[#allocation8 + $0x18] sm:$0xff] %v1275_v61 }
 0x431   :  { %1293 = dma.vmem_to_hbm [thread:$0]  %s1286_s11, 512, %s1288_s14, [#allocation4], %s1568_s27, %s1568_s27, %s1569_s28  }
 0x432   :  { %1562 = dma.done.wait [#allocation4], 512  }
 0x433   :  { %1563 = vsyncadd [#allocation4], 4294966784 }
 0x434   :  { %1298 = vsyncpa [#allocation3], 1 }
 0x435   :  { %1299 = vsyncpa [#allocation6], 1 }
 0x436   :  { %1300 = vsyncpa [#allocation4], 1 }

</bundles_post_ra>
